<compile_context>
chip_gen: v7x
topology: tpu7x:2x2x1
jax: 0.10.0
libtpu: 0.0.40
codegen_flags: <defaults>
</compile_context>

<pallas_src>
import functools
import math

import jax
import jax.numpy as jnp
from jax.experimental import pallas as pl
from jax.experimental.pallas import tpu as pltpu


# ----------------------------- in-kernel helpers -----------------------------

def _layernorm(x, w, b, eps=1e-6):
    mu = jnp.mean(x, axis=-1, keepdims=True)
    var = jnp.mean((x - mu) ** 2, axis=-1, keepdims=True)
    return (x - mu) * jax.lax.rsqrt(var + eps) * w + b


def _gelu(x):
    # TODO(synk): PyTorch F.gelu default is the exact erf formulation; we use
    # the tanh approximation (max ~1e-3 diff) to stay on guaranteed
    # Mosaic-supported transcendentals.
    c = math.sqrt(2.0 / math.pi)
    return 0.5 * x * (1.0 + jnp.tanh(c * (x + 0.044715 * x * x * x)))


# ------------------------------- Pallas kernel --------------------------------

def encoder_kernel(num_heads, matmul_dtype,
                   x_ref,
                   ln1_w, ln1_b, wq, bq, wk, bk, wv, bv, wo, bo,
                   ln2_w, ln2_b, w1, b1, w2, b2,
                   enc_w, enc_b,
                   o_ref,
                   acc_ref):
    """One (batch_block, layer) grid step of the fused Encoder.

    acc_ref is a (B_blk, S, H) f32 VMEM scratch holding the activations for the
    current batch block; it is carried across the layer ("arbitrary") grid axis.
    """
    l = pl.program_id(1)
    num_layers = pl.num_programs(1)

    @pl.when(l == 0)
    def _():
        acc_ref[...] = x_ref[...].astype(jnp.float32)

    Bb, S, H = acc_ref.shape
    M = Bb * S                           # batch rows folded into the matmul M dim
    hd = H // num_heads
    scale = 1.0 / math.sqrt(hd)

    x = acc_ref[...].reshape(M, H)       # leading-dim merge only (cheap)

    def mm(a_lp, w_ref, b_ref):
        # Low-precision activations x bf16 HBM weights on the MXU, f32 accumulate,
        # f32 bias add.  No per-use weight cast (weights already stored bf16).
        return (jnp.dot(a_lp, w_ref[...], preferred_element_type=jnp.float32)
                + b_ref[...])

    # ---------------- attention branch (pre-LN) ----------------
    h_res = x
    xn = _layernorm(x, ln1_w[...], ln1_b[...])
    xn_bf = xn.astype(matmul_dtype)      # cast once, reused for Q/K/V matmuls

    q = mm(xn_bf, wq, bq)                # (M, H) f32
    k = mm(xn_bf, wk, bk)
    v = mm(xn_bf, wv, bv)

    def to_heads(t):
        # (M, H) -> (num_heads*Bb, S, hd).  Cast to bf16 first so the head-split
        # relayout moves half the bytes; the trailing regroup of leading dims is
        # layout-cheap.
        t = t.astype(matmul_dtype).reshape(M, num_heads, hd)
        t = jnp.transpose(t, (1, 0, 2))                 # (nh, M, hd)
        return t.reshape(num_heads * Bb, S, hd)         # (nh*Bb, S, hd)

    q3, k3, v3 = to_heads(q), to_heads(k), to_heads(v)

    # Batched attention: one einsum per matmul, batch dim = heads * batch rows.
    scores = jnp.einsum('gqd,gkd->gqk', q3, k3,
                        preferred_element_type=jnp.float32) * scale
    scores = scores - jnp.max(scores, axis=-1, keepdims=True)
    e = jnp.exp(scores)
    probs = e * pl.reciprocal(jnp.sum(e, axis=-1, keepdims=True), approx=True)

    ctx = jnp.einsum('gqk,gkd->gqd', probs.astype(matmul_dtype), v3,
                     preferred_element_type=jnp.float32)
    # (nh*Bb, S, hd) -> (M, H); cast to bf16 before the relayout.
    ctx = ctx.astype(matmul_dtype).reshape(num_heads, M, hd)
    ctx = jnp.transpose(ctx, (1, 0, 2)).reshape(M, H)

    x = mm(ctx, wo, bo) + h_res

    # ---------------- MLP branch (pre-LN) ----------------
    h_res = x
    xn = _layernorm(x, ln2_w[...], ln2_b[...])
    mid = _gelu(mm(xn.astype(matmul_dtype), w1, b1))     # (M, 3H) f32
    x = mm(mid.astype(matmul_dtype), w2, b2) + h_res

    acc_ref[...] = x.reshape(Bb, S, H)

    @pl.when(l == num_layers - 1)
    def _():
        # Final encoder LayerNorm fused into the last layer step.
        o_ref[...] = _layernorm(x, enc_w[...], enc_b[...]).reshape(
            Bb, S, H).astype(o_ref.dtype)


# ------------------------------ Python wrapper --------------------------------

def _pick_batch_block(B, S, H, num_heads, max_act_bytes=24 * 1024 * 1024):
    """Fold as many batch rows as possible into the matmul M dim while
    (a) keeping >= 2 parallel grid steps when B allows it (v7x has 2 TCs) and
    (b) keeping the per-step f32 activation footprint bounded."""
    if B <= 1:
        return 1
    best = 1
    for d in range(1, B):
        if B % d != 0 or (B // d) < 2:
            continue
        act = 4 * d * (8 * S * H + 2 * S * 3 * H + 2 * num_heads * S * S)
        if act <= max_act_bytes:
            best = d
    return best


def _vmem_budget_bytes():
    """Physical VMEM capacity minus headroom for Mosaic's internal scratch."""
    try:
        cap = int(pltpu.get_tpu_info().vmem_capacity_bytes)
    except Exception:
        cap = 64 * 1024 * 1024           # conservative (v7x per-TensorCore)
    return max(16 * 1024 * 1024, cap - 12 * 1024 * 1024)


def encoder_forward(hidden_states, params, num_heads,
                    matmul_dtype=jnp.bfloat16, batch_block=None):
    """Fused Encoder forward.  params = stacked per-layer weights + final LN."""
    B, S, H = hidden_states.shape
    assert H % num_heads == 0
    (ln1_w, ln1_b, wq, bq, wk, bk, wv, bv, wo, bo,
     ln2_w, ln2_b, w1, b1, w2, b2, enc_w, enc_b) = params
    L = wq.shape[0]
    M3 = 3 * H

    if batch_block is None:
        batch_block = _pick_batch_block(B, S, H, num_heads)
    assert B % batch_block == 0
    num_b_blocks = B // batch_block

    def wspec(*shape):
        # per-layer parameter: leading (squeezed) layer axis indexed by l.
        return pl.BlockSpec((None,) + shape, lambda b, l: (l,) + (0,) * len(shape))

    in_specs = [
        pl.BlockSpec((batch_block, S, H), lambda b, l: (b, 0, 0)),  # x (resident per b)
        wspec(1, H), wspec(1, H),                             # ln1 w, b   (f32)
        wspec(H, H), wspec(1, H),                             # query      (bf16 / f32)
        wspec(H, H), wspec(1, H),                             # key
        wspec(H, H), wspec(1, H),                             # value
        wspec(H, H), wspec(1, H),                             # out proj
        wspec(1, H), wspec(1, H),                             # ln2 w, b   (f32)
        wspec(H, M3), wspec(1, M3),                           # fc1
        wspec(M3, H), wspec(1, H),                            # fc2
        pl.BlockSpec((1, H), lambda b, l: (0, 0)),             # encoder_norm w
        pl.BlockSpec((1, H), lambda b, l: (0, 0)),             # encoder_norm b
    ]

    # --- VMEM budget + cost estimate ---
    stacked = (ln1_w, ln1_b, wq, bq, wk, bk, wv, bv, wo, bo,
               ln2_w, ln2_b, w1, b1, w2, b2)
    param_bytes = sum(int(p.size) * p.dtype.itemsize for p in stacked)
    enc_bytes = int(enc_w.size) * enc_w.dtype.itemsize + int(enc_b.size) * enc_b.dtype.itemsize
    layer_block_bytes = param_bytes // L
    io_block_bytes = batch_block * S * H * hidden_states.dtype.itemsize
    acc_bytes = 4 * batch_block * S * H
    act_bytes = 4 * batch_block * (8 * S * H + 2 * S * M3 + 2 * num_heads * S * S)
    need = (2 * layer_block_bytes            # double-buffered per-layer weights
            + 4 * io_block_bytes             # x + out blocks, double-buffered
            + acc_bytes + act_bytes + 2 * enc_bytes)
    budget = _vmem_budget_bytes()
    vmem_limit = int(min(budget, max(32 * 1024 * 1024, need)))

    flops = int(2 * L * B * (10 * S * H * H + 2 * S * S * H))
    transcendentals = int(L * B * (num_heads * S * S + S * M3))
    io_bytes = 2 * B * S * H * hidden_states.dtype.itemsize
    # Weights are re-streamed once per (batch-block, all layers) visit.
    bytes_accessed = int(io_bytes + num_b_blocks * (param_bytes + enc_bytes))

    return pl.pallas_call(
        functools.partial(encoder_kernel, num_heads, matmul_dtype),
        out_shape=jax.ShapeDtypeStruct((B, S, H), hidden_states.dtype),
        grid=(num_b_blocks, L),
        in_specs=in_specs,
        out_specs=pl.BlockSpec((batch_block, S, H), lambda b, l: (b, 0, 0)),
        scratch_shapes=[pltpu.VMEM((batch_block, S, H), jnp.float32)],
        compiler_params=pltpu.CompilerParams(
            dimension_semantics=("parallel", "arbitrary"),
            vmem_limit_bytes=vmem_limit),
        cost_estimate=pl.CostEstimate(flops=flops,
                                      transcendentals=transcendentals,
                                      bytes_accessed=bytes_accessed),
    )(hidden_states, ln1_w, ln1_b, wq, bq, wk, bk, wv, bv, wo, bo,
      ln2_w, ln2_b, w1, b1, w2, b2, enc_w, enc_b)


# ---------------------------- deterministic params ----------------------------

_WEIGHT_IDX = (2, 4, 6, 8, 12, 14)   # wq, wk, wv, wo, w1, w2 (stored low-precision)


def init_encoder_params(key, hidden_size, num_layers, weight_dtype=jnp.bfloat16):
    """PyTorch-matching init; per-layer tensors stacked along axis 0.  The six
    matmul weights are stored in `weight_dtype` (bf16) in HBM; LN params and
    biases stay f32."""
    H = hidden_size
    M3 = 3 * H

    def linear(k, fan_in, fan_out, xavier=False, bias_std=None):
        kw, kb = jax.random.split(k)
        if xavier:
            limit = math.sqrt(6.0 / (fan_in + fan_out))      # xavier_uniform_
        else:
            limit = 1.0 / math.sqrt(fan_in)                  # PyTorch Linear default
        W = jax.random.uniform(kw, (fan_in, fan_out), jnp.float32, -limit, limit)
        if bias_std is not None:
            b = bias_std * jax.random.normal(kb, (1, fan_out), jnp.float32)
        else:
            b = jax.random.uniform(kb, (1, fan_out), jnp.float32, -limit, limit)
        return W, b

    per_layer = []
    for _ in range(num_layers):
        key, *ks = jax.random.split(key, 7)
        wq, bq = linear(ks[0], H, H)
        wk, bk = linear(ks[1], H, H)
        wv, bv = linear(ks[2], H, H)
        wo, bo = linear(ks[3], H, H)
        w1, b1 = linear(ks[4], H, M3, xavier=True, bias_std=1e-6)
        w2, b2 = linear(ks[5], M3, H, xavier=True, bias_std=1e-6)
        ln1_w = jnp.ones((1, H), jnp.float32)
        ln1_b = jnp.zeros((1, H), jnp.float32)
        ln2_w = jnp.ones((1, H), jnp.float32)
        ln2_b = jnp.zeros((1, H), jnp.float32)
        per_layer.append((ln1_w, ln1_b, wq, bq, wk, bk, wv, bv, wo, bo,
                          ln2_w, ln2_b, w1, b1, w2, b2))

    stacked = tuple(
        jnp.stack([layer[i] for layer in per_layer], axis=0).astype(
            weight_dtype if i in _WEIGHT_IDX else jnp.float32)
        for i in range(16))
    enc_w = jnp.ones((1, H), jnp.float32)
    enc_b = jnp.zeros((1, H), jnp.float32)
    return stacked + (enc_w, enc_b)


# ------------------------------------ main ------------------------------------

if __name__ == "__main__":
    # Small shapes consistent with the Encoder forward: (B, S, hidden_size).
    # B=4 exercises both batch folding (B_blk=2) and a 2-way parallel batch axis.
    B, S, H = 4, 8, 32
    num_layers = 2
    num_heads = 4
    dropout_rate = 0.1               # identity at inference
    attention_dropout_rate = 0.1     # identity at inference

    key = jax.random.PRNGKey(0)
    k_params, k_x = jax.random.split(key)
    params = init_encoder_params(k_params, H, num_layers)
    hidden_states = jax.random.normal(k_x, (B, S, H), jnp.float32)

    fwd = jax.jit(functools.partial(encoder_forward,
                                    num_heads=num_heads,
                                    matmul_dtype=jnp.bfloat16))
    encoded = fwd(hidden_states, params)
    jax.block_until_ready(encoded)

    assert encoded.shape == (B, S, H) and encoded.dtype == jnp.float32
    assert bool(jnp.all(jnp.isfinite(encoded)))
    print("KERNEL_OK")
</pallas_src>

<mosaic_0001>
module attributes {stable_mosaic.version = 11 : i64} {
  func.func @encoder_kernel(%arg0: i32, %arg1: i32, %arg2: memref<2x8x32xf32, #tpu.memory_space<vmem>>, %arg3: memref<1x1x32xf32, #tpu.memory_space<vmem>>, %arg4: memref<1x1x32xf32, #tpu.memory_space<vmem>>, %arg5: memref<1x32x32xbf16, #tpu.memory_space<vmem>>, %arg6: memref<1x1x32xf32, #tpu.memory_space<vmem>>, %arg7: memref<1x32x32xbf16, #tpu.memory_space<vmem>>, %arg8: memref<1x1x32xf32, #tpu.memory_space<vmem>>, %arg9: memref<1x32x32xbf16, #tpu.memory_space<vmem>>, %arg10: memref<1x1x32xf32, #tpu.memory_space<vmem>>, %arg11: memref<1x32x32xbf16, #tpu.memory_space<vmem>>, %arg12: memref<1x1x32xf32, #tpu.memory_space<vmem>>, %arg13: memref<1x1x32xf32, #tpu.memory_space<vmem>>, %arg14: memref<1x1x32xf32, #tpu.memory_space<vmem>>, %arg15: memref<1x32x96xbf16, #tpu.memory_space<vmem>>, %arg16: memref<1x1x96xf32, #tpu.memory_space<vmem>>, %arg17: memref<1x96x32xbf16, #tpu.memory_space<vmem>>, %arg18: memref<1x1x32xf32, #tpu.memory_space<vmem>>, %arg19: memref<1x32xf32, #tpu.memory_space<vmem>>, %arg20: memref<1x32xf32, #tpu.memory_space<vmem>>, %arg21: memref<2x8x32xf32, #tpu.memory_space<vmem>>, %arg22: memref<2x8x32xf32, #tpu.memory_space<vmem>>) attributes {dimension_semantics = [#tpu.dimension_semantics<parallel>, #tpu.dimension_semantics<arbitrary>], iteration_bounds = array<i64: 2, 2>, scalar_prefetch = 0 : i64, scratch_operands = 1 : i64, tpu.core_type = #tpu.core_type<tc>, window_params = [{transform_indices = @transform_0, window_bounds = array<i64: 2, 8, 32>}, {transform_indices = @transform_1, window_bounds = array<i64: 1, 1, 32>}, {transform_indices = @transform_2, window_bounds = array<i64: 1, 1, 32>}, {transform_indices = @transform_3, window_bounds = array<i64: 1, 32, 32>}, {transform_indices = @transform_4, window_bounds = array<i64: 1, 1, 32>}, {transform_indices = @transform_5, window_bounds = array<i64: 1, 32, 32>}, {transform_indices = @transform_6, window_bounds = array<i64: 1, 1, 32>}, {transform_indices = @transform_7, window_bounds = array<i64: 1, 32, 32>}, {transform_indices = @transform_8, window_bounds = array<i64: 1, 1, 32>}, {transform_indices = @transform_9, window_bounds = array<i64: 1, 32, 32>}, {transform_indices = @transform_10, window_bounds = array<i64: 1, 1, 32>}, {transform_indices = @transform_11, window_bounds = array<i64: 1, 1, 32>}, {transform_indices = @transform_12, window_bounds = array<i64: 1, 1, 32>}, {transform_indices = @transform_13, window_bounds = array<i64: 1, 32, 96>}, {transform_indices = @transform_14, window_bounds = array<i64: 1, 1, 96>}, {transform_indices = @transform_15, window_bounds = array<i64: 1, 96, 32>}, {transform_indices = @transform_16, window_bounds = array<i64: 1, 1, 32>}, {pipeline_mode = #tpu.pipeline_mode<synchronous>, transform_indices = @transform_17, window_bounds = array<i64: 1, 32>}, {pipeline_mode = #tpu.pipeline_mode<synchronous>, transform_indices = @transform_18, window_bounds = array<i64: 1, 32>}, {transform_indices = @transform_19, window_bounds = array<i64: 2, 8, 32>}]} {
    %c0_i32 = arith.constant 0 : i32
    %0 = arith.cmpi eq, %arg1, %c0_i32 : i32
    %1 = arith.extui %0 : i1 to i32
    %c0_i32_0 = arith.constant 0 : i32
    %2 = arith.cmpi ne, %1, %c0_i32_0 : i32
    scf.if %2 {
      %c0_79 = arith.constant 0 : index
      %c0_80 = arith.constant 0 : index
      %c0_81 = arith.constant 0 : index
      %153 = vector.load %arg2[%c0_79, %c0_80, %c0_81] : memref<2x8x32xf32, #tpu.memory_space<vmem>>, vector<2x8x32xf32>
      %c0_82 = arith.constant 0 : index
      %c0_83 = arith.constant 0 : index
      %c0_84 = arith.constant 0 : index
      %154 = vector.load %arg22[%c0_82, %c0_83, %c0_84] : memref<2x8x32xf32, #tpu.memory_space<vmem>>, vector<2x8x32xf32>
      tpu.vector_store %arg22[%c0_82, %c0_83, %c0_84], %153 {strides = array<i32>} : memref<2x8x32xf32, #tpu.memory_space<vmem>>, vector<2x8x32xf32>,
    } else {
    }
    %c0 = arith.constant 0 : index
    %c0_1 = arith.constant 0 : index
    %c0_2 = arith.constant 0 : index
    %3 = vector.load %arg22[%c0, %c0_1, %c0_2] : memref<2x8x32xf32, #tpu.memory_space<vmem>>, vector<2x8x32xf32>
    %4 = vector.shape_cast %3 : vector<2x8x32xf32> to vector<16x32xf32>
    %c0_3 = arith.constant 0 : index
    %c0_4 = arith.constant 0 : index
    %c0_5 = arith.constant 0 : index
    %5 = vector.load %arg3[%c0_3, %c0_4, %c0_5] : memref<1x1x32xf32, #tpu.memory_space<vmem>>, vector<1x1x32xf32>
    %6 = vector.shape_cast %5 : vector<1x1x32xf32> to vector<1x32xf32>
    %c0_6 = arith.constant 0 : index
    %c0_7 = arith.constant 0 : index
    %c0_8 = arith.constant 0 : index
    %7 = vector.load %arg4[%c0_6, %c0_7, %c0_8] : memref<1x1x32xf32, #tpu.memory_space<vmem>>, vector<1x1x32xf32>
    %8 = vector.shape_cast %7 : vector<1x1x32xf32> to vector<1x32xf32>
    %cst = arith.constant dense<0.000000e+00> : vector<16xf32>
    %9 = vector.multi_reduction <add>, %4, %cst [1] : vector<16x32xf32> to vector<16xf32>
    %10 = vector.shape_cast %9 : vector<16xf32> to vector<16x1xf32>
    %cst_9 = arith.constant 3.200000e+01 : f32
    %11 = vector.broadcast %cst_9 : f32 to vector<16x1xf32>
    %12 = arith.divf %10, %11 : vector<16x1xf32>
    %13 = vector.broadcast %12 : vector<16x1xf32> to vector<16x32xf32>
    %14 = arith.subf %4, %13 : vector<16x32xf32>
    %15 = arith.mulf %14, %14 : vector<16x32xf32>
    %cst_10 = arith.constant dense<0.000000e+00> : vector<16xf32>
    %16 = vector.multi_reduction <add>, %15, %cst_10 [1] : vector<16x32xf32> to vector<16xf32>
    %17 = vector.shape_cast %16 : vector<16xf32> to vector<16x1xf32>
    %cst_11 = arith.constant 3.200000e+01 : f32
    %18 = vector.broadcast %cst_11 : f32 to vector<16x1xf32>
    %19 = arith.divf %17, %18 : vector<16x1xf32>
    %20 = vector.broadcast %12 : vector<16x1xf32> to vector<16x32xf32>
    %21 = arith.subf %4, %20 : vector<16x32xf32>
    %cst_12 = arith.constant 9.99999997E-7 : f32
    %22 = vector.broadcast %cst_12 : f32 to vector<16x1xf32>
    %23 = arith.addf %19, %22 : vector<16x1xf32>
    %24 = math.rsqrt %23 : vector<16x1xf32>
    %25 = vector.broadcast %24 : vector<16x1xf32> to vector<16x32xf32>
    %26 = arith.mulf %21, %25 : vector<16x32xf32>
    %27 = vector.broadcast %6 : vector<1x32xf32> to vector<16x32xf32>
    %28 = arith.mulf %26, %27 : vector<16x32xf32>
    %29 = vector.broadcast %8 : vector<1x32xf32> to vector<16x32xf32>
    %30 = arith.addf %28, %29 : vector<16x32xf32>
    %31 = arith.truncf %30 : vector<16x32xf32> to vector<16x32xbf16>
    %c0_13 = arith.constant 0 : index
    %c0_14 = arith.constant 0 : index
    %c0_15 = arith.constant 0 : index
    %32 = vector.load %arg5[%c0_13, %c0_14, %c0_15] : memref<1x32x32xbf16, #tpu.memory_space<vmem>>, vector<1x32x32xbf16>
    %33 = vector.shape_cast %32 : vector<1x32x32xbf16> to vector<32x32xbf16>
    %cst_16 = arith.constant dense<0.000000e+00> : vector<16x32xf32>
    %34 = tpu.matmul %31, %33, %cst_16 {dimension_numbers = #tpu.dot_dimension_numbers<[1], [0], [0], [1], [0, 0, 1, 1], [], []>} : vector<16x32xbf16>, vector<32x32xbf16>, vector<16x32xf32> -> vector<16x32xf32>
    %c0_17 = arith.constant 0 : index
    %c0_18 = arith.constant 0 : index
    %c0_19 = arith.constant 0 : index
    %35 = vector.load %arg6[%c0_17, %c0_18, %c0_19] : memref<1x1x32xf32, #tpu.memory_space<vmem>>, vector<1x1x32xf32>
    %36 = vector.shape_cast %35 : vector<1x1x32xf32> to vector<1x32xf32>
    %37 = vector.broadcast %36 : vector<1x32xf32> to vector<16x32xf32>
    %38 = arith.addf %34, %37 : vector<16x32xf32>
    %c0_20 = arith.constant 0 : index
    %c0_21 = arith.constant 0 : index
    %c0_22 = arith.constant 0 : index
    %39 = vector.load %arg7[%c0_20, %c0_21, %c0_22] : memref<1x32x32xbf16, #tpu.memory_space<vmem>>, vector<1x32x32xbf16>
    %40 = vector.shape_cast %39 : vector<1x32x32xbf16> to vector<32x32xbf16>
    %cst_23 = arith.constant dense<0.000000e+00> : vector<16x32xf32>
    %41 = tpu.matmul %31, %40, %cst_23 {dimension_numbers = #tpu.dot_dimension_numbers<[1], [0], [0], [1], [0, 0, 1, 1], [], []>} : vector<16x32xbf16>, vector<32x32xbf16>, vector<16x32xf32> -> vector<16x32xf32>
    %c0_24 = arith.constant 0 : index
    %c0_25 = arith.constant 0 : index
    %c0_26 = arith.constant 0 : index
    %42 = vector.load %arg8[%c0_24, %c0_25, %c0_26] : memref<1x1x32xf32, #tpu.memory_space<vmem>>, vector<1x1x32xf32>
    %43 = vector.shape_cast %42 : vector<1x1x32xf32> to vector<1x32xf32>
    %44 = vector.broadcast %43 : vector<1x32xf32> to vector<16x32xf32>
    %45 = arith.addf %41, %44 : vector<16x32xf32>
    %c0_27 = arith.constant 0 : index
    %c0_28 = arith.constant 0 : index
    %c0_29 = arith.constant 0 : index
    %46 = vector.load %arg9[%c0_27, %c0_28, %c0_29] : memref<1x32x32xbf16, #tpu.memory_space<vmem>>, vector<1x32x32xbf16>
    %47 = vector.shape_cast %46 : vector<1x32x32xbf16> to vector<32x32xbf16>
    %cst_30 = arith.constant dense<0.000000e+00> : vector<16x32xf32>
    %48 = tpu.matmul %31, %47, %cst_30 {dimension_numbers = #tpu.dot_dimension_numbers<[1], [0], [0], [1], [0, 0, 1, 1], [], []>} : vector<16x32xbf16>, vector<32x32xbf16>, vector<16x32xf32> -> vector<16x32xf32>
    %c0_31 = arith.constant 0 : index
    %c0_32 = arith.constant 0 : index
    %c0_33 = arith.constant 0 : index
    %49 = vector.load %arg10[%c0_31, %c0_32, %c0_33] : memref<1x1x32xf32, #tpu.memory_space<vmem>>, vector<1x1x32xf32>
    %50 = vector.shape_cast %49 : vector<1x1x32xf32> to vector<1x32xf32>
    %51 = vector.broadcast %50 : vector<1x32xf32> to vector<16x32xf32>
    %52 = arith.addf %48, %51 : vector<16x32xf32>
    %53 = arith.truncf %38 : vector<16x32xf32> to vector<16x32xbf16>
    %54 = vector.shape_cast %53 : vector<16x32xbf16> to vector<16x4x8xbf16>
    %55 = tpu.transpose %54, [1, 0, 2] : vector<16x4x8xbf16> -> vector<4x16x8xbf16>
    %56 = vector.shape_cast %55 : vector<4x16x8xbf16> to vector<8x8x8xbf16>
    %57 = arith.truncf %45 : vector<16x32xf32> to vector<16x32xbf16>
    %58 = vector.shape_cast %57 : vector<16x32xbf16> to vector<16x4x8xbf16>
    %59 = tpu.transpose %58, [1, 0, 2] : vector<16x4x8xbf16> -> vector<4x16x8xbf16>
    %60 = vector.shape_cast %59 : vector<4x16x8xbf16> to vector<8x8x8xbf16>
    %61 = arith.truncf %52 : vector<16x32xf32> to vector<16x32xbf16>
    %62 = vector.shape_cast %61 : vector<16x32xbf16> to vector<16x4x8xbf16>
    %63 = tpu.transpose %62, [1, 0, 2] : vector<16x4x8xbf16> -> vector<4x16x8xbf16>
    %64 = vector.shape_cast %63 : vector<4x16x8xbf16> to vector<8x8x8xbf16>
    "tpu.trace_start"() <{level = 10 : i32, message = "gqd,gkd->gqk"}> : () -> ()
    %cst_34 = arith.constant dense<0.000000e+00> : vector<8x8x8xf32>
    %65 = tpu.matmul %56, %60, %cst_34 {dimension_numbers = #tpu.dot_dimension_numbers<[2], [2], [1], [1], [0, 0, 0, 1, 1, 1], [0], [0]>} : vector<8x8x8xbf16>, vector<8x8x8xbf16>, vector<8x8x8xf32> -> vector<8x8x8xf32>
    "tpu.trace_stop"() : () -> ()
    %cst_35 = arith.constant 0.353553385 : f32
    %66 = vector.broadcast %cst_35 : f32 to vector<8x8x8xf32>
    %67 = arith.mulf %65, %66 : vector<8x8x8xf32>
    %cst_36 = arith.constant dense<0xFF800000> : vector<8x8xf32>
    %68 = vector.multi_reduction <maximumf>, %67, %cst_36 [2] : vector<8x8x8xf32> to vector<8x8xf32>
    %69 = vector.shape_cast %68 : vector<8x8xf32> to vector<8x8x1xf32>
    %70 = vector.broadcast %69 : vector<8x8x1xf32> to vector<8x8x8xf32>
    %71 = arith.subf %67, %70 : vector<8x8x8xf32>
    %72 = math.exp %71 : vector<8x8x8xf32>
    %cst_37 = arith.constant dense<0.000000e+00> : vector<8x8xf32>
    %73 = vector.multi_reduction <add>, %72, %cst_37 [2] : vector<8x8x8xf32> to vector<8x8xf32>
    %74 = vector.shape_cast %73 : vector<8x8xf32> to vector<8x8x1xf32>
    %75 = tpu.reciprocal %74 {approx = true} : vector<8x8x1xf32> -> vector<8x8x1xf32>
    %76 = vector.broadcast %75 : vector<8x8x1xf32> to vector<8x8x8xf32>
    %77 = arith.mulf %72, %76 : vector<8x8x8xf32>
    %78 = arith.truncf %77 : vector<8x8x8xf32> to vector<8x8x8xbf16>
    "tpu.trace_start"() <{level = 10 : i32, message = "gqk,gkd->gqd"}> : () -> ()
    %cst_38 = arith.constant dense<0.000000e+00> : vector<8x8x8xf32>
    %79 = tpu.matmul %78, %64, %cst_38 {dimension_numbers = #tpu.dot_dimension_numbers<[2], [1], [1], [2], [0, 0, 0, 1, 1, 2], [0], [0]>} : vector<8x8x8xbf16>, vector<8x8x8xbf16>, vector<8x8x8xf32> -> vector<8x8x8xf32>
    "tpu.trace_stop"() : () -> ()
    %80 = arith.truncf %79 : vector<8x8x8xf32> to vector<8x8x8xbf16>
    %81 = vector.shape_cast %80 : vector<8x8x8xbf16> to vector<4x16x8xbf16>
    %82 = tpu.transpose %81, [1, 0, 2] : vector<4x16x8xbf16> -> vector<16x4x8xbf16>
    %83 = vector.shape_cast %82 : vector<16x4x8xbf16> to vector<16x32xbf16>
    %c0_39 = arith.constant 0 : index
    %c0_40 = arith.constant 0 : index
    %c0_41 = arith.constant 0 : index
    %84 = vector.load %arg11[%c0_39, %c0_40, %c0_41] : memref<1x32x32xbf16, #tpu.memory_space<vmem>>, vector<1x32x32xbf16>
    %85 = vector.shape_cast %84 : vector<1x32x32xbf16> to vector<32x32xbf16>
    %cst_42 = arith.constant dense<0.000000e+00> : vector<16x32xf32>
    %86 = tpu.matmul %83, %85, %cst_42 {dimension_numbers = #tpu.dot_dimension_numbers<[1], [0], [0], [1], [0, 0, 1, 1], [], []>} : vector<16x32xbf16>, vector<32x32xbf16>, vector<16x32xf32> -> vector<16x32xf32>
    %c0_43 = arith.constant 0 : index
    %c0_44 = arith.constant 0 : index
    %c0_45 = arith.constant 0 : index
    %87 = vector.load %arg12[%c0_43, %c0_44, %c0_45] : memref<1x1x32xf32, #tpu.memory_space<vmem>>, vector<1x1x32xf32>
    %88 = vector.shape_cast %87 : vector<1x1x32xf32> to vector<1x32xf32>
    %89 = vector.broadcast %88 : vector<1x32xf32> to vector<16x32xf32>
    %90 = arith.addf %86, %89 : vector<16x32xf32>
    %91 = arith.addf %90, %4 : vector<16x32xf32>
    %c0_46 = arith.constant 0 : index
    %c0_47 = arith.constant 0 : index
    %c0_48 = arith.constant 0 : index
    %92 = vector.load %arg13[%c0_46, %c0_47, %c0_48] : memref<1x1x32xf32, #tpu.memory_space<vmem>>, vector<1x1x32xf32>
    %93 = vector.shape_cast %92 : vector<1x1x32xf32> to vector<1x32xf32>
    %c0_49 = arith.constant 0 : index
    %c0_50 = arith.constant 0 : index
    %c0_51 = arith.constant 0 : index
    %94 = vector.load %arg14[%c0_49, %c0_50, %c0_51] : memref<1x1x32xf32, #tpu.memory_space<vmem>>, vector<1x1x32xf32>
    %95 = vector.shape_cast %94 : vector<1x1x32xf32> to vector<1x32xf32>
    %cst_52 = arith.constant dense<0.000000e+00> : vector<16xf32>
    %96 = vector.multi_reduction <add>, %91, %cst_52 [1] : vector<16x32xf32> to vector<16xf32>
    %97 = vector.shape_cast %96 : vector<16xf32> to vector<16x1xf32>
    %cst_53 = arith.constant 3.200000e+01 : f32
    %98 = vector.broadcast %cst_53 : f32 to vector<16x1xf32>
    %99 = arith.divf %97, %98 : vector<16x1xf32>
    %100 = vector.broadcast %99 : vector<16x1xf32> to vector<16x32xf32>
    %101 = arith.subf %91, %100 : vector<16x32xf32>
    %102 = arith.mulf %101, %101 : vector<16x32xf32>
    %cst_54 = arith.constant dense<0.000000e+00> : vector<16xf32>
    %103 = vector.multi_reduction <add>, %102, %cst_54 [1] : vector<16x32xf32> to vector<16xf32>
    %104 = vector.shape_cast %103 : vector<16xf32> to vector<16x1xf32>
    %cst_55 = arith.constant 3.200000e+01 : f32
    %105 = vector.broadcast %cst_55 : f32 to vector<16x1xf32>
    %106 = arith.divf %104, %105 : vector<16x1xf32>
    %107 = vector.broadcast %99 : vector<16x1xf32> to vector<16x32xf32>
    %108 = arith.subf %91, %107 : vector<16x32xf32>
    %cst_56 = arith.constant 9.99999997E-7 : f32
    %109 = vector.broadcast %cst_56 : f32 to vector<16x1xf32>
    %110 = arith.addf %106, %109 : vector<16x1xf32>
    %111 = math.rsqrt %110 : vector<16x1xf32>
    %112 = vector.broadcast %111 : vector<16x1xf32> to vector<16x32xf32>
    %113 = arith.mulf %108, %112 : vector<16x32xf32>
    %114 = vector.broadcast %93 : vector<1x32xf32> to vector<16x32xf32>
    %115 = arith.mulf %113, %114 : vector<16x32xf32>
    %116 = vector.broadcast %95 : vector<1x32xf32> to vector<16x32xf32>
    %117 = arith.addf %115, %116 : vector<16x32xf32>
    %118 = arith.truncf %117 : vector<16x32xf32> to vector<16x32xbf16>
    %c0_57 = arith.constant 0 : index
    %c0_58 = arith.constant 0 : index
    %c0_59 = arith.constant 0 : index
    %119 = vector.load %arg15[%c0_57, %c0_58, %c0_59] : memref<1x32x96xbf16, #tpu.memory_space<vmem>>, vector<1x32x96xbf16>
    %120 = vector.shape_cast %119 : vector<1x32x96xbf16> to vector<32x96xbf16>
    %cst_60 = arith.constant dense<0.000000e+00> : vector<16x96xf32>
    %121 = tpu.matmul %118, %120, %cst_60 {dimension_numbers = #tpu.dot_dimension_numbers<[1], [0], [0], [1], [0, 0, 1, 1], [], []>} : vector<16x32xbf16>, vector<32x96xbf16>, vector<16x96xf32> -> vector<16x96xf32>
    %c0_61 = arith.constant 0 : index
    %c0_62 = arith.constant 0 : index
    %c0_63 = arith.constant 0 : index
    %122 = vector.load %arg16[%c0_61, %c0_62, %c0_63] : memref<1x1x96xf32, #tpu.memory_space<vmem>>, vector<1x1x96xf32>
    %123 = vector.shape_cast %122 : vector<1x1x96xf32> to vector<1x96xf32>
    %124 = vector.broadcast %123 : vector<1x96xf32> to vector<16x96xf32>
    %125 = arith.addf %121, %124 : vector<16x96xf32>
    %cst_64 = arith.constant 5.000000e-01 : f32
    %126 = vector.broadcast %cst_64 : f32 to vector<16x96xf32>
    %127 = arith.mulf %126, %125 : vector<16x96xf32>
    %cst_65 = arith.constant 4.471500e-02 : f32
    %128 = vector.broadcast %cst_65 : f32 to vector<16x96xf32>
    %129 = arith.mulf %128, %125 : vector<16x96xf32>
    %130 = arith.mulf %129, %125 : vector<16x96xf32>
    %131 = arith.mulf %130, %125 : vector<16x96xf32>
    %132 = arith.addf %125, %131 : vector<16x96xf32>
    %cst_66 = arith.constant 0.797884583 : f32
    %133 = vector.broadcast %cst_66 : f32 to vector<16x96xf32>
    %134 = arith.mulf %133, %132 : vector<16x96xf32>
    %135 = math.tanh %134 : vector<16x96xf32>
    %cst_67 = arith.constant 1.000000e+00 : f32
    %136 = vector.broadcast %cst_67 : f32 to vector<16x96xf32>
    %137 = arith.addf %136, %135 : vector<16x96xf32>
    %138 = arith.mulf %127, %137 : vector<16x96xf32>
    %139 = arith.truncf %138 : vector<16x96xf32> to vector<16x96xbf16>
    %c0_68 = arith.constant 0 : index
    %c0_69 = arith.constant 0 : index
    %c0_70 = arith.constant 0 : index
    %140 = vector.load %arg17[%c0_68, %c0_69, %c0_70] : memref<1x96x32xbf16, #tpu.memory_space<vmem>>, vector<1x96x32xbf16>
    %141 = vector.shape_cast %140 : vector<1x96x32xbf16> to vector<96x32xbf16>
    %cst_71 = arith.constant dense<0.000000e+00> : vector<16x32xf32>
    %142 = tpu.matmul %139, %141, %cst_71 {dimension_numbers = #tpu.dot_dimension_numbers<[1], [0], [0], [1], [0, 0, 1, 1], [], []>} : vector<16x96xbf16>, vector<96x32xbf16>, vector<16x32xf32> -> vector<16x32xf32>
    %c0_72 = arith.constant 0 : index
    %c0_73 = arith.constant 0 : index
    %c0_74 = arith.constant 0 : index
    %143 = vector.load %arg18[%c0_72, %c0_73, %c0_74] : memref<1x1x32xf32, #tpu.memory_space<vmem>>, vector<1x1x32xf32>
    %144 = vector.shape_cast %143 : vector<1x1x32xf32> to vector<1x32xf32>
    %145 = vector.broadcast %144 : vector<1x32xf32> to vector<16x32xf32>
    %146 = arith.addf %142, %145 : vector<16x32xf32>
    %147 = arith.addf %146, %91 : vector<16x32xf32>
    %148 = vector.shape_cast %147 : vector<16x32xf32> to vector<2x8x32xf32>
    %c0_75 = arith.constant 0 : index
    %c0_76 = arith.constant 0 : index
    %c0_77 = arith.constant 0 : index
    %149 = vector.load %arg22[%c0_75, %c0_76, %c0_77] : memref<2x8x32xf32, #tpu.memory_space<vmem>>, vector<2x8x32xf32>
    tpu.vector_store %arg22[%c0_75, %c0_76, %c0_77], %148 {strides = array<i32>} : memref<2x8x32xf32, #tpu.memory_space<vmem>>, vector<2x8x32xf32>,
    %c1_i32 = arith.constant 1 : i32
    %150 = arith.cmpi eq, %arg1, %c1_i32 : i32
    %151 = arith.extui %150 : i1 to i32
    %c0_i32_78 = arith.constant 0 : i32
    %152 = arith.cmpi ne, %151, %c0_i32_78 : i32
    scf.if %152 {
      %c0_79 = arith.constant 0 : index
      %c0_80 = arith.constant 0 : index
      %153 = vector.load %arg19[%c0_79, %c0_80] : memref<1x32xf32, #tpu.memory_space<vmem>>, vector<1x32xf32>
      %c0_81 = arith.constant 0 : index
      %c0_82 = arith.constant 0 : index
      %154 = vector.load %arg20[%c0_81, %c0_82] : memref<1x32xf32, #tpu.memory_space<vmem>>, vector<1x32xf32>
      %cst_83 = arith.constant dense<0.000000e+00> : vector<16xf32>
      %155 = vector.multi_reduction <add>, %147, %cst_83 [1] : vector<16x32xf32> to vector<16xf32>
      %156 = vector.shape_cast %155 : vector<16xf32> to vector<16x1xf32>
      %cst_84 = arith.constant 3.200000e+01 : f32
      %157 = vector.broadcast %cst_84 : f32 to vector<16x1xf32>
      %158 = arith.divf %156, %157 : vector<16x1xf32>
      %159 = vector.broadcast %158 : vector<16x1xf32> to vector<16x32xf32>
      %160 = arith.subf %147, %159 : vector<16x32xf32>
      %161 = arith.mulf %160, %160 : vector<16x32xf32>
      %cst_85 = arith.constant dense<0.000000e+00> : vector<16xf32>
      %162 = vector.multi_reduction <add>, %161, %cst_85 [1] : vector<16x32xf32> to vector<16xf32>
      %163 = vector.shape_cast %162 : vector<16xf32> to vector<16x1xf32>
      %cst_86 = arith.constant 3.200000e+01 : f32
      %164 = vector.broadcast %cst_86 : f32 to vector<16x1xf32>
      %165 = arith.divf %163, %164 : vector<16x1xf32>
      %166 = vector.broadcast %158 : vector<16x1xf32> to vector<16x32xf32>
      %167 = arith.subf %147, %166 : vector<16x32xf32>
      %cst_87 = arith.constant 9.99999997E-7 : f32
      %168 = vector.broadcast %cst_87 : f32 to vector<16x1xf32>
      %169 = arith.addf %165, %168 : vector<16x1xf32>
      %170 = math.rsqrt %169 : vector<16x1xf32>
      %171 = vector.broadcast %170 : vector<16x1xf32> to vector<16x32xf32>
      %172 = arith.mulf %167, %171 : vector<16x32xf32>
      %173 = vector.broadcast %153 : vector<1x32xf32> to vector<16x32xf32>
      %174 = arith.mulf %172, %173 : vector<16x32xf32>
      %175 = vector.broadcast %154 : vector<1x32xf32> to vector<16x32xf32>
      %176 = arith.addf %174, %175 : vector<16x32xf32>
      %177 = vector.shape_cast %176 : vector<16x32xf32> to vector<2x8x32xf32>
      %c0_88 = arith.constant 0 : index
      %c0_89 = arith.constant 0 : index
      %c0_90 = arith.constant 0 : index
      %178 = vector.load %arg21[%c0_88, %c0_89, %c0_90] : memref<2x8x32xf32, #tpu.memory_space<vmem>>, vector<2x8x32xf32>
      tpu.vector_store %arg21[%c0_88, %c0_89, %c0_90], %177 {strides = array<i32>} : memref<2x8x32xf32, #tpu.memory_space<vmem>>, vector<2x8x32xf32>,
    } else {
    }
    return
  }
  func.func @transform_0(%arg0: i32, %arg1: i32) -> (i32, i32, i32) {
    %c0_i32 = arith.constant 0 : i32
    %c0_i32_0 = arith.constant 0 : i32
    %c0_i32_1 = arith.constant 0 : i32
    return %arg0, %c0_i32, %c0_i32_0 : i32, i32, i32
  }
  func.func @transform_1(%arg0: i32, %arg1: i32) -> (i32, i32, i32) {
    %c0_i32 = arith.constant 0 : i32
    %c0_i32_0 = arith.constant 0 : i32
    %c0_i32_1 = arith.constant 0 : i32
    return %arg1, %c0_i32, %c0_i32_0 : i32, i32, i32
  }
  func.func @transform_2(%arg0: i32, %arg1: i32) -> (i32, i32, i32) {
    %c0_i32 = arith.constant 0 : i32
    %c0_i32_0 = arith.constant 0 : i32
    %c0_i32_1 = arith.constant 0 : i32
    return %arg1, %c0_i32, %c0_i32_0 : i32, i32, i32
  }
  func.func @transform_3(%arg0: i32, %arg1: i32) -> (i32, i32, i32) {
    %c0_i32 = arith.constant 0 : i32
    %c0_i32_0 = arith.constant 0 : i32
    %c0_i32_1 = arith.constant 0 : i32
    return %arg1, %c0_i32, %c0_i32_0 : i32, i32, i32
  }
  func.func @transform_4(%arg0: i32, %arg1: i32) -> (i32, i32, i32) {
    %c0_i32 = arith.constant 0 : i32
    %c0_i32_0 = arith.constant 0 : i32
    %c0_i32_1 = arith.constant 0 : i32
    return %arg1, %c0_i32, %c0_i32_0 : i32, i32, i32
  }
  func.func @transform_5(%arg0: i32, %arg1: i32) -> (i32, i32, i32) {
    %c0_i32 = arith.constant 0 : i32
    %c0_i32_0 = arith.constant 0 : i32
    %c0_i32_1 = arith.constant 0 : i32
    return %arg1, %c0_i32, %c0_i32_0 : i32, i32, i32
  }
  func.func @transform_6(%arg0: i32, %arg1: i32) -> (i32, i32, i32) {
    %c0_i32 = arith.constant 0 : i32
    %c0_i32_0 = arith.constant 0 : i32
    %c0_i32_1 = arith.constant 0 : i32
    return %arg1, %c0_i32, %c0_i32_0 : i32, i32, i32
  }
  func.func @transform_7(%arg0: i32, %arg1: i32) -> (i32, i32, i32) {
    %c0_i32 = arith.constant 0 : i32
    %c0_i32_0 = arith.constant 0 : i32
    %c0_i32_1 = arith.constant 0 : i32
    return %arg1, %c0_i32, %c0_i32_0 : i32, i32, i32
  }
  func.func @transform_8(%arg0: i32, %arg1: i32) -> (i32, i32, i32) {
    %c0_i32 = arith.constant 0 : i32
    %c0_i32_0 = arith.constant 0 : i32
    %c0_i32_1 = arith.constant 0 : i32
    return %arg1, %c0_i32, %c0_i32_0 : i32, i32, i32
  }
  func.func @transform_9(%arg0: i32, %arg1: i32) -> (i32, i32, i32) {
    %c0_i32 = arith.constant 0 : i32
    %c0_i32_0 = arith.constant 0 : i32
    %c0_i32_1 = arith.constant 0 : i32
    return %arg1, %c0_i32, %c0_i32_0 : i32, i32, i32
  }
  func.func @transform_10(%arg0: i32, %arg1: i32) -> (i32, i32, i32) {
    %c0_i32 = arith.constant 0 : i32
    %c0_i32_0 = arith.constant 0 : i32
    %c0_i32_1 = arith.constant 0 : i32
    return %arg1, %c0_i32, %c0_i32_0 : i32, i32, i32
  }
  func.func @transform_11(%arg0: i32, %arg1: i32) -> (i32, i32, i32) {
    %c0_i32 = arith.constant 0 : i32
    %c0_i32_0 = arith.constant 0 : i32
    %c0_i32_1 = arith.constant 0 : i32
    return %arg1, %c0_i32, %c0_i32_0 : i32, i32, i32
  }
  func.func @transform_12(%arg0: i32, %arg1: i32) -> (i32, i32, i32) {
    %c0_i32 = arith.constant 0 : i32
    %c0_i32_0 = arith.constant 0 : i32
    %c0_i32_1 = arith.constant 0 : i32
    return %arg1, %c0_i32, %c0_i32_0 : i32, i32, i32
  }
  func.func @transform_13(%arg0: i32, %arg1: i32) -> (i32, i32, i32) {
    %c0_i32 = arith.constant 0 : i32
    %c0_i32_0 = arith.constant 0 : i32
    %c0_i32_1 = arith.constant 0 : i32
    return %arg1, %c0_i32, %c0_i32_0 : i32, i32, i32
  }
  func.func @transform_14(%arg0: i32, %arg1: i32) -> (i32, i32, i32) {
    %c0_i32 = arith.constant 0 : i32
    %c0_i32_0 = arith.constant 0 : i32
    %c0_i32_1 = arith.constant 0 : i32
    return %arg1, %c0_i32, %c0_i32_0 : i32, i32, i32
  }
  func.func @transform_15(%arg0: i32, %arg1: i32) -> (i32, i32, i32) {
    %c0_i32 = arith.constant 0 : i32
    %c0_i32_0 = arith.constant 0 : i32
    %c0_i32_1 = arith.constant 0 : i32
    return %arg1, %c0_i32, %c0_i32_0 : i32, i32, i32
  }
  func.func @transform_16(%arg0: i32, %arg1: i32) -> (i32, i32, i32) {
    %c0_i32 = arith.constant 0 : i32
    %c0_i32_0 = arith.constant 0 : i32
    %c0_i32_1 = arith.constant 0 : i32
    return %arg1, %c0_i32, %c0_i32_0 : i32, i32, i32
  }
  func.func @transform_17(%arg0: i32, %arg1: i32) -> (i32, i32) {
    %c0_i32 = arith.constant 0 : i32
    %c0_i32_0 = arith.constant 0 : i32
    %c0_i32_1 = arith.constant 0 : i32
    return %c0_i32, %c0_i32_0 : i32, i32
  }
  func.func @transform_18(%arg0: i32, %arg1: i32) -> (i32, i32) {
    %c0_i32 = arith.constant 0 : i32
    %c0_i32_0 = arith.constant 0 : i32
    %c0_i32_1 = arith.constant 0 : i32
    return %c0_i32, %c0_i32_0 : i32, i32
  }
  func.func @transform_19(%arg0: i32, %arg1: i32) -> (i32, i32, i32) {
    %c0_i32 = arith.constant 0 : i32
    %c0_i32_0 = arith.constant 0 : i32
    %c0_i32_1 = arith.constant 0 : i32
    return %arg0, %c0_i32, %c0_i32_0 : i32, i32, i32
  }
}

</mosaic_0001>

<bundles_post_ra>
// kernel: encoder_forward.1
= control target key start
LH: loop header
LB: loop body
LE: loop exit
PB: predicated region body
PF: predicated region fallthrough
CT: control target
= control target key end

     0   :  { %s5433_s0 = inlined_call_operand.vmem [shape: f32[4,8,32], index: 0, kind: input, shape index: {}]   ;;  %s5434_s1 = inlined_call_operand.vmem [shape: f32[2,1,32], index: 1, kind: input, shape index: {}]   ;;  %s5435_s2 = inlined_call_operand.vmem [shape: f32[2,1,32], index: 2, kind: input, shape index: {}]   ;;  %s5436_s3 = inlined_call_operand.vmem [shape: bf16[2,32,32], index: 3, kind: input, shape index: {}]   ;;  %s5437_s4 = inlined_call_operand.vmem [shape: f32[2,1,32], index: 4, kind: input, shape index: {}]   ;;  %s5438_s5 = inlined_call_operand.vmem [shape: bf16[2,32,32], index: 5, kind: input, shape index: {}]   ;;  %s5439_s6 = inlined_call_operand.vmem [shape: f32[2,1,32], index: 6, kind: input, shape index: {}]   ;;  %s5440_s7 = inlined_call_operand.vmem [shape: bf16[2,32,32], index: 7, kind: input, shape index: {}]   ;;  %s5441_s8 = inlined_call_operand.vmem [shape: f32[2,1,32], index: 8, kind: input, shape index: {}]   ;;  %s5442_s9 = inlined_call_operand.hbm [shape: bf16[2,32,32], index: 9, kind: input, shape index: {}]   ;;  %s5443_s10 = inlined_call_operand.vmem [shape: f32[2,1,32], index: 10, kind: input, shape index: {}]   ;;  %s5444_s11 = inlined_call_operand.vmem [shape: f32[2,1,32], index: 11, kind: input, shape index: {}]   ;;  %s5445_s12 = inlined_call_operand.vmem [shape: f32[2,1,32], index: 12, kind: input, shape index: {}]   ;;  %s5446_s13 = inlined_call_operand.hbm [shape: bf16[2,32,96], index: 13, kind: input, shape index: {}]   ;;  %s5447_s14 = inlined_call_operand.vmem [shape: f32[2,1,96], index: 14, kind: input, shape index: {}]   ;;  %s5448_s15 = inlined_call_operand.vmem [shape: bf16[2,96,32], index: 15, kind: input, shape index: {}]   ;;  %s5449_s16 = inlined_call_operand.vmem [shape: f32[2,1,32], index: 16, kind: input, shape index: {}]   ;;  %s5450_s17 = inlined_call_operand.vmem [shape: f32[1,32], index: 17, kind: input, shape index: {}]   ;;  %s5451_s18 = inlined_call_operand.vmem [shape: f32[1,32], index: 18, kind: input, shape index: {}]   ;;  %s5452_s19 = inlined_call_operand.hbm [shape: f32[4,8,32], index: 19, kind: output, shape index: {}]  }
   0x1   :  { %5477 = sst [smem:[#allocation29_spill]] %s5433_s0 }
   0x2   :  { %5478 = sst [smem:[#allocation30_spill]] %s5434_s1 }
   0x3   :  { %5479 = sst [smem:[#allocation31_spill]] %s5435_s2 }
   0x4   :  { %5480 = sst [smem:[#allocation32_spill]] %s5436_s3 }
   0x5   :  { %5481 = sst [smem:[#allocation33_spill]] %s5438_s5 }
   0x6   :  { %5482 = sst [smem:[#allocation34_spill]] %s5440_s7 }
   0x7   :  { %5483 = sst [smem:[#allocation35_spill]] %s5441_s8 }
   0x8   :  { %5484 = sst [smem:[#allocation36_spill]] %s5442_s9 }
   0x9   :  { %5485 = sst [smem:[#allocation37_spill]] %s5446_s13 }
   0xa   :  { %5486 = sst [smem:[#allocation38_spill]] %s5447_s14 }
   0xb   :  { %5487 = sst [smem:[#allocation39_spill]] %s5448_s15 }
   0xc   :  { %5488 = sst [smem:[#allocation40_spill]] %s5449_s16 }
   0xd   :  { %5489 = sst [smem:[#allocation41_spill]] %s5450_s17 }
   0xe   :  { %5490 = sst [smem:[#allocation42_spill]] %s5451_s18 }
   0xf   :  { %5491 = sst [smem:[#allocation43_spill]] %s5452_s19 }
  0x10   :  { %24 = vsyncpa [#allocation4], 0 }
  0x11   :  { %26 = vsyncpa [#allocation4 + $0x1], 0 }
  0x12   :  { %27 = vsyncpa [#allocation7], 0 }
  0x13   :  { %29 = vsyncpa [#allocation7 + $0x1], 0 }
  0x14   :  { %30 = vsyncpa [#allocation5], 0 }
  0x15   :  { %32 = vsyncpa [#allocation5 + $0x1], 0  ;;  %s4642_s0 = smov 0   ;;  %s4644_s30 = smov 0  }
  0x16   :  { %s4646_s20 = smov 0   ;;  %s4648_s21 = smov 0  }
  0x17   :  { %s4650_s1 = smov 0   ;;  %s4652_s22 = smov 0  }
  0x18   :  { %s4654_s2 = smov 0   ;;  %s4656_s23 = smov 0  }
  0x19   :  { %s4658_s24 = smov 0   ;;  %s4660_s25 = smov 0  }
  0x1a   :  { %s4662_s3 = smov 0  }
  0x1b LB: > { %5492 = sst [smem:[#allocation12_spill]] %s4483_s0  ;;  %s3813_s26 = sadd.s32 4294967295, %s4523_s3   ;;  %s4523_s3 = sphi %s4662_s3, %s38_s3   ;;  %s4519_s25 = sphi %s4660_s25, %s5566_s25   ;;  %s4515_s24 = sphi %s4658_s24, %s5565_s24   ;;  %s4511_s23 = sphi %s4656_s23, %s5564_s23   ;;  %s4507_s2 = sphi %s4654_s2, %s5563_s2   ;;  %s4503_s22 = sphi %s4652_s22, %s5562_s22   ;;  %s4499_s1 = sphi %s4650_s1, %s5561_s1   ;;  %s4495_s21 = sphi %s4648_s21, %s5560_s21   ;;  %s4491_s20 = sphi %s4646_s20, %s5559_s20   ;;  %s4487_s30 = sphi %s4644_s30, %s5558_s30   ;;  %s4483_s0 = sphi %s4642_s0, %s5557_s0  }
  0x1c   : > { %5493 = sst [smem:[#allocation13_spill]] %s4487_s30  ;;  %s3814_s27 = sadd.s32 4294967294, %s4523_s3  }
  0x1d   : > { %5494 = sst [smem:[#allocation14_spill]] %s4491_s20  ;;  %s47_s28 = sadd.s32 1, %s4515_s24 }
  0x1e   : > { %5495 = sst [smem:[#allocation15_spill]] %s4499_s1  ;;  %s50_s29 = sadd.s32 1, %s4519_s25 }
  0x1f   : > { %5496 = sst [smem:[#allocation16_spill]] %s4503_s22  ;;  %p48_p0 = scmp.ge.s32.totalorder %s47_s28, 2 }
  0x20   : > { %5497 = sst [smem:[#allocation17_spill]] %s4511_s23  ;;  %s291_s19 = sadd.s32 1, %s4503_s22 }
  0x21   : > { %5498 = sst [smem:[#allocation18_spill]] %s4515_s24  ;;  %p298_p1 = scmp.ne.s32.totalorder %s4503_s22, %s4499_s1 }
  0x22   : > { %5499 = sst [smem:[#allocation19_spill]] %s4519_s25  ;;  %p299_p2 = scmp.eq.s32.totalorder %s4523_s3, 0 }
  0x23   : > { %5500 = sst [smem:[#allocation20_spill]] %s4523_s3  ;;  %s5568_s28 = smov (%p48_p0, %s47_s28), 0 }
  0x24   : > { %5501 = sst [smem:[#allocation21_spill]] %s5568_s28  ;;  %s5570_s29 = smov (!%p48_p0, %s50_s29), %s4519_s25 }
  0x25   : > { %s288_s18 = ssub.s32 %s4515_s24, %s5568_s28  ;;  %p4708_p3 = por %p299_p2, %p298_p1 }
  0x26   : > { %p52_p4 = scmp.ge.s32.totalorder %s5570_s29, 2  ;;  %p289_p5 = scmp.eq.s32.totalorder %s288_s18, 0 }
  0x27   : > { %p304_p6 = scmp.ne.s32.totalorder %s4499_s1, %s4495_s21  ;;  %p305_p7 = scmp.eq.s32.totalorder %s3813_s26, 0 }
  0x28   : > { %s5572_s29 = smov (%p52_p4, %s5570_s29), 0  ;;  %s541_s14 = sadd.s32 1, %s4491_s20 }
  0x29   : > { %5503 = sst [smem:[#allocation22_spill]] %s5572_s29  ;;  %p4718_p8 = por %p305_p7, %p304_p6 }
  0x2a   : > { %s4716_s15 = scalar_select %p289_p5, %s4503_s22, %s291_s19  }
  0x2b   : > { %s5505_s28 = scalar_select %p4718_p8, 1, 0 }
  0x2c   : > { %5504 = sst [smem:[#allocation23_spill]] %s4716_s15  ;;  %s538_s16 = ssub.s32 %s4519_s25, %s5572_s29 }
  0x2d   : > { %p539_p9 = scmp.eq.s32.totalorder %s538_s16, 0  ;;  %p551_p10 = scmp.ne.s32.totalorder %s4491_s20, %s4487_s30 }
  0x2e   : > { %p552_p11 = scmp.eq.s32.totalorder %s3813_s26, 3  ;;  %p557_p13 = scmp.ne.s32.totalorder %s4487_s30, %s4483_s0 }
  0x2f   : > { %s4728_s18 = scalar_select %p539_p9, %s4491_s20, %s541_s14  }
  0x30   : > { %p4730_p12 = por %p552_p11, %p551_p10  ;;  %p558_p0 = scmp.eq.s32.totalorder %s3814_s27, 3 }
  0x31   : > { %5506 = sst [smem:[#allocation24_spill]] %s4728_s18  ;;  %p4167_p1 = scmp.lt.s32.totalorder %s4523_s3, 4 }
  0x32   : > { %s5507_s21 = scalar_select %p4730_p12, 1, 0 }
  0x33   : > { %s4738_s19 = sand.u32 1, %s4503_s22   ;;  %p4740_p2 = por %p558_p0, %p557_p13 }
  0x34   : > { %5508 = sst [smem:[#allocation25_spill]] %s5507_s21  ;;  %s5459_s29 = sshll.u32 %s4738_s19, 4 }
  0x35   : > { %s5509_s16 = scalar_select %p4740_p2, 1, 0 }
  0x36   : > { %s5460_s26 = sshll.u32 %s4515_s24, 8  ;;  %s5511_s9 = sld [smem:[#allocation36_spill]] }
  0x37   : > { %5510 = sst [smem:[#allocation26_spill]] %s5509_s16  ;;  %s651_s27 = scalar_lea.vmem [#allocation3], %s5459_s29 }
  0x38   : > { %s658_s22 = sshll.u32 %s651_s27, 4  ;;  %p4757_p4 = pnand %p4167_p1, %p4708_p3  ;;  %s4761_s22 = int_to_ptr.vmem [resolvable:$true] %s658_s22 }
  0x3a   : > { %p4339_p6 = pneg %p4757_p4 }
  0x3c   : > { %s4751_s15 = scalar_lea.hbm %s5511_s9, %s5460_s26  ;;  %s4342_s17 = scalar_lea.hbm %s5511_s9, 512 }
  0x3d   : > { %s4337_s25 = scalar_lea.hbm %s4751_s15, 256  ;;  %p4343_p3 = scmp.lt.u32.totalorder %s4751_s15, %s5511_s9 }
  0x3e   : > { %p4338_p5 = scmp.ne.s32.totalorder %s4751_s15, %s4337_s25  ;;  %p4344_p10 = scmp.lt.u32.totalorder %s4342_s17, %s4337_s25 }
  0x3f   : > { %p4346_p13 = scmp.lt.u32.totalorder %s4337_s25, %s4751_s15 }
  0x40   : > { %p4340_p7 = pnand %p4339_p6, %p4338_p5  ;;  %p4345_p11 = por %p4344_p10, %p4343_p3 }
  0x42   : > { %p4341_p9 = pneg %p4340_p7  ;;  %p4347_p0 = por %p4346_p13, %p4345_p11 }
  0x44   : > { %p4348_p1 = pnand %p4347_p0, %p4341_p9 }
  0x46   : > { %4351 = shalt.err (!%p4348_p1)
}
  0x47   : > { %s4352_s20 = scalar_lea.vmem %s4761_s22, 256  ;;  %s4525_s14 = smov [#allocation3]  }
  0x48   : > { %p4353_p5 = scmp.ne.s32.totalorder %s4761_s22, %s4352_s20  ;;  %s4357_s27 = sshll.u32 %s4525_s14, 4  ;;  %s4358_s27 = int_to_ptr.vmem [resolvable:$false] %s4357_s27 }
  0x49   : > { %s4359_s29 = scalar_lea.vmem %s4358_s27, 512  ;;  %p4360_p12 = scmp.lt.s32.totalorder %s4761_s22, %s4358_s27 }
  0x4a   : > { %p4355_p7 = pnand %p4353_p5, %p4339_p6  ;;  %p4361_p3 = scmp.lt.s32.totalorder %s4359_s29, %s4352_s20 }
  0x4c   : > { %p4356_p2 = pneg %p4355_p7  ;;  %p4362_p10 = por %p4361_p3, %p4360_p12 }
  0x4e   : > { %p4363_p11 = pnand %p4362_p10, %p4356_p2 }
  0x50   : > { %4366 = shalt.err (!%p4363_p11)
}
  0x51   : > { %s5466_s26 = smov 64   ;;  %s4527_s25 = smov 4  }
  0x52   : > { %s5513_s20 = scalar_lea.sflag [#allocation4], %s4738_s19  ;;  %p3823_p12 = scmp.ge.s32.totalorder %s4523_s3, 1 }
  0x53   : > { %4159 = dma.hbm_to_vmem [thread:$0]  (!%p4757_p4), %s4751_s15, 256, %s4761_s22, %s5513_s20, %s5466_s26, %s5466_s26, %s4527_s25  }
  0x54   : > { %p725_p2 = scmp.lt.s32.totalorder %s4523_s3, 5  ;;  %s5515_s14 = sshll.u32 %s4515_s24, 8 }
  0x55   : > { %s5516_s13 = sld [smem:[#allocation37_spill]]  ;;  %s5517_s16 = sshll.u32 %s4738_s19, 4 }
  0x56   : > { %p4796_p9 = pnand %p3823_p12, %p725_p2  ;;  %s690_s0 = scalar_lea.vmem [#allocation6], %s5517_s16 }
  0x57   : > { %s697_s21 = sshll.u32 %s690_s0, 4  ;;  %s687_s15 = scalar_lea.sflag [#allocation7], %s4738_s19  ;;  %s4809_s21 = int_to_ptr.vmem [resolvable:$true] %s697_s21 }
  0x5b   : > { %s4805_s9 = scalar_lea.hbm %s5516_s13, %s5515_s14  ;;  %s4372_s14 = scalar_lea.hbm %s5516_s13, 512 }
  0x5c   : > { %s4367_s22 = scalar_lea.hbm %s4805_s9, 256  ;;  %p4373_p5 = scmp.lt.u32.totalorder %s4805_s9, %s5516_s13 }
  0x5d   : > { %p4368_p13 = scmp.ne.s32.totalorder %s4805_s9, %s4367_s22  ;;  %p4374_p7 = scmp.lt.u32.totalorder %s4372_s14, %s4367_s22 }
  0x5e   : > { %p4376_p10 = scmp.lt.u32.totalorder %s4367_s22, %s4805_s9 }
  0x5f   : > { %p4370_p0 = pnand %p4368_p13, %p4339_p6  ;;  %p4375_p3 = por %p4374_p7, %p4373_p5 }
  0x61   : > { %p4371_p1 = pneg %p4370_p0  ;;  %p4377_p11 = por %p4376_p10, %p4375_p3 }
  0x63   : > { %p4378_p12 = pnand %p4377_p11, %p4371_p1 }
  0x65   : > { %4381 = shalt.err (!%p4378_p12)
}
  0x66   : > { %s4382_s0 = scalar_lea.vmem %s4809_s21, 256  ;;  %s4528_s16 = smov [#allocation6]  }
  0x67   : > { %p4383_p2 = scmp.ne.s32.totalorder %s4809_s21, %s4382_s0  ;;  %s4387_s20 = sshll.u32 %s4528_s16, 4  ;;  %s4388_s20 = int_to_ptr.vmem [resolvable:$false] %s4387_s20 }
  0x68   : > { %s4389_s26 = scalar_lea.vmem %s4388_s20, 512  ;;  %p4390_p8 = scmp.lt.s32.totalorder %s4809_s21, %s4388_s20 }
  0x69   : > { %p4385_p13 = pnand %p4383_p2, %p4339_p6  ;;  %p4391_p5 = scmp.lt.s32.totalorder %s4389_s26, %s4382_s0 }
  0x6b   : > { %p4386_p0 = pneg %p4385_p13  ;;  %p4392_p7 = por %p4391_p5, %p4390_p8 }
  0x6d   : > { %p4393_p3 = pnand %p4392_p7, %p4386_p0 }
  0x6f   : > { %4396 = shalt.err (!%p4393_p3)
}
  0x70   : > { %s5518_s22 = smov 64   ;;  %729 = sbr.rel (%p4796_p9) target bundleno = 3113 (0xc29), region = 96 }
  0x71   : > { %4162 = dma.hbm_to_vmem [thread:$0]  (!%p4757_p4), %s4805_s9, 256, %s4809_s21, %s687_s15, %s5518_s22, %s5518_s22, %s4527_s25  }
  0x77   : > { %s731_s27 = sand.u32 1, %s4499_s1   ;;  %p5520_p8 = scmp.ne.s32.totalorder %s5505_s28, 0 }
  0x78   : > { %s3824_s14 = sshll.u32 %s731_s27, 4  ;;  %s732_s29 = scalar_lea.sflag [#allocation4], %s731_s27 }
  0x79   : > { %s4843_s0 = scalar_lea.vmem [#allocation3], %s3824_s14 }
  0x7a   : > { %5519 = sst [smem:[#allocation27_spill]] %s4843_s0 }
  0x7b   : > { %4470 = dma.done.wait (%p5520_p8), %s732_s29, 256  }
  0x7c   : > { %4472 = vsyncadd (%p5520_p8), %s732_s29, 4294967040  ;;  %s741_s18 = scalar_lea.sflag [#allocation7], %s731_s27  ;;  %s4849_s19 = scalar_lea.vmem [#allocation6], %s3824_s14 }
  0x7d   : > { %5521 = sst [smem:[#allocation28_spill]] %s4849_s19 }
  0x7e   : > { %4474 = dma.done.wait (%p5520_p8), %s741_s18, 256  }
  0x7f   : > { %4476 = vsyncadd (%p5520_p8), %s741_s18, 4294967040  ;;  %s5468_s9 = sand.u32 1, %s4487_s30   ;;  %s3827_s21 = sshll.u32 %s4511_s23, 1 }
  0x80   : > { %s3826_s25 = sshll.u32 %s5468_s9, 4  ;;  %p860_p4 = scmp.lt.s32.totalorder %s3827_s21, 3 }
  0x81   : > { %p865_p6 = scmp.lt.s32.totalorder %s4507_s2, 1  ;;  %s5522_s20 = sld [smem:[#allocation29_spill]] }
  0x82   : > { %s5574_s21 = smov (!%p860_p4, %s3827_s21), 3  ;;  %s5525_s23 = sld [smem:[#allocation32_spill]] }
  0x83   : > { %s4861_s17 = scalar_select %p865_p6, %s4507_s2, 1 }
  0x84   : > { %s3828_s28 = sshll.u32 %s5574_s21, 3  ;;  %s5526_s5 = sld [smem:[#allocation33_spill]] }
  0x85   : > { %s3939_s1 = sshll.u32 %s4861_s17, 4  ;;  %s5527_s7 = sld [smem:[#allocation34_spill]] }
  0x86   : > { %s900_s24 = scalar_lea.vmem %s5444_s11, %s4861_s17  ;;  %s903_s27 = scalar_lea.vmem %s5445_s12, %s4861_s17 }
  0x87   : > { %s863_s26 = scalar_lea.vmem %s5522_s20, %s3828_s28  ;;  %s5531_s21 = sld [smem:[#allocation39_spill]] }
  0x88   : > { %s4878_s19 = scalar_lea.vmem %s5525_s23, %s3939_s1  ;;  %s5530_s23 = sld [smem:[#allocation40_spill]] }
  0x89   : > { %s4928_s16 = scalar_lea.vmem [#allocation8], %s3826_s25  ;;  %p3836_p9 = scmp.ne.s32.totalorder %s4507_s2, 0 }
  0x8a   : > { %s4887_s20 = scalar_lea.vmem %s5526_s5, %s3939_s1  ;;  %s4149_s5 = smul.u32 48, %s4861_s17  ;;  %v921_v0 = vld [vmem:[%s863_s26] sm:$0xff] (!%p3836_p9)  ;;  %vm923_vm0 = vcmask (!%p3836_p9), 261120   ;;  %v922_v1 = vld [vmem:[%s863_s26 + $0x8] sm:$0xff] (!%p3836_p9) }
  0x8b   : > { %s4896_s18 = scalar_lea.vmem %s5527_s7, %s3939_s1  ;;  %s5529_s1 = sld [smem:[#allocation38_spill]]  ;;  %924 = vst.msk [vmem:[#allocation2] sm:$0xff] (!%p3836_p9), %vm923_vm0, %v921_v0  ;;  %925 = vst.msk [vmem:[#allocation2 + $0x8] sm:$0xff] (!%p3836_p9), %vm923_vm0, %v922_v1 }
  0x8c   : > { %920 = sbr.rel (%p3836_p9) target bundleno = 147 (0x93), region = 108 }
  0x8d   : > { %s4926_s15 = scalar_lea.vmem %s5531_s21, %s4149_s5 }
  0x8e   : > { %s914_s3 = scalar_lea.vmem %s5530_s23, %s4861_s17 }
  0x91   : > { %s906_s14 = scalar_lea.vmem %s5529_s1, %s4861_s17 }
  0x93 PF: > { %v926_v2 = vld [vmem:[#allocation2] sm:$0xff]  ;;  %vm930_vm1 = vcmask 261120   ;;  %v927_v3 = vld [vmem:[#allocation2 + $0x8] sm:$0xff]  ;;  %v4529_v17 = vmov 0.0   ;;  %vm4530_vm2 = vmmov 0   ;;  %s5532_s8 = sld [smem:[#allocation30_spill]]  ;;  %s5536_s22 = scalar_lea.vmem %s5437_s4, %s4861_s17 }
  0x94   : > { %v931_v4 = vsel %vm930_vm1, %v926_v2, 0.0  ;;  %v934_v5 = vsel %vm930_vm1, %v927_v3, 0.0  ;;  %v4271_v16 = vld [vmem:[%s4878_s19] sm:$0xff]   ;;  %3997 = vmatprep.subr.bf16.mxu0 %v4529_v17  ;;  %4021 = vmatprep.subr.bf16.mxu1 %v4529_v17  ;;  %v4272_v18 = vld [vmem:[%s4878_s19 + $0x8] sm:$0xff]   ;;  %s5534_s29 = sld [smem:[#allocation31_spill]]  ;;  %s5537_s1 = scalar_lea.vmem %s5439_s6, %s4861_s17  ;;  %vm2028_vm3 = vcmask 64512  }
  0x95   : > { %932 = vadd.xlane.f32.xlu0 %v931_v4  ;;  %3998 = vmatpush3.bf16.msra.mxu0 %v4271_v16  ;;  %v4273_v35 = vld [vmem:[%s4887_s20] sm:$0xff]   ;;  %v4274_v37 = vld [vmem:[%s4887_s20 + $0x8] sm:$0xff]   ;;  %s4531_s30 = smov 112   ;;  %s4532_s23 = smov 120   ;;  %v4534_v0 = vmov 1983009808  }
  0x96   : > { %4001 = vmatprep.mubr.msk.bf16.mxu0 %vm4530_vm2, %v4529_v17  ;;  %3999 = vmatprep.subr.bf16.mxu0 %v4529_v17  ;;  %v4275_v38 = vld [vmem:[%s4896_s18] sm:$0xff]   ;;  %v4276_v39 = vld [vmem:[%s4896_s18 + $0x8] sm:$0xff]   ;;  %s5538_s5 = sld [smem:[#allocation35_spill]]  ;;  %v1202_v1 = vunpack.c.l.s4 %v4534_v0  ;;  %vm2504_vm4 = vcmask 1043456   ;;  %s4537_s25 = smov 8   ;;  %vm3183_vm5 = vcmask 130048  }
  0x97   : > { %4023 = vmatprep.mubr.msk.bf16.mxu1 %vm4530_vm2, %v4529_v17  ;;  %v3839_v40 = vld [vmem:[%s5536_s22] ss:$0 sm:$0xff]  ;;  %s4538_s26 = smov 16   ;;  %vm3186_vm6 = vcmask 195584   ;;  %s5541_s28 = scalar_lea.vmem %s5443_s10, %s4861_s17  ;;  %vm3443_vm7 = vcmask 785408  }
  0x98   : > { %v3843_v48 = vld [vmem:[%s5537_s1] ss:$0 sm:$0xff]  ;;  %s5542_s22 = sld [smem:[#allocation28_spill]]  ;;  %p3929_p1 = scmp.ne.s32.totalorder %s4507_s2, 1 }
  0x99   : > { %935 = vadd.xlane.f32.xlu0 %v934_v5  ;;  %4000 = vmatpush3.bf16.msra.mxu0 %v4272_v18  ;;  %s5533_s19 = scalar_lea.vmem %s5532_s8, %s4861_s17  ;;  %s4533_s8 = smov 104   ;;  %v4535_v5 = vmov 1934713408  }
  0x9a   : > { %4005 = vmatprep.subr.bf16.mxu0 %v4529_v17  ;;  %v3837_v27 = vld [vmem:[%s5533_s19] ss:$0 sm:$0xff]  ;;  %s5535_s9 = scalar_lea.vmem %s5534_s29, %s4861_s17  ;;  %s5540_s19 = sld [smem:[#allocation27_spill]] }
  0x9b   : > { %v3838_v31 = vld [vmem:[%s5535_s9] ss:$0 sm:$0xff]  ;;  %s4539_s29 = smov 24  }
  0x9c   : > { %s5539_s7 = scalar_lea.vmem %s5538_s5, %s4861_s17 }
  0x9d   : > { %v3847_v56 = vld [vmem:[%s5539_s7] ss:$0 sm:$0xff]  ;;  %s5546_s7 = sld [smem:[#allocation42_spill]] (!%p3929_p1) }
 0x122   : > { %v933_v6 = vpop.xlane.xlu0 %932 }
 0x123   : > { %v938_v7 = vmul.f32 0.03125, %v933_v6  ;;  %v1233_v6 = vunpack.c.l.s4 %v4535_v5 }
 0x125   : > { %v940_v8 = vsub.f32 %v926_v2, %v938_v7  ;;  %v1204_v2 = vlaneseq  ;;  %v1234_v16 = vunpack.c.0.s8 %v1233_v6 }
 0x126   : > { %v936_v9 = vpop.xlane.xlu0 %935 }
 0x127   : > { %v939_v10 = vmul.f32 0.03125, %v936_v9  ;;  %v942_v11 = vmul.f32 %v940_v8, %v940_v8  ;;  %v1205_v4 = vshrl.u32 %v1204_v2, 7 }
 0x129   : > { %v941_v12 = vsub.f32 %v927_v3, %v939_v10  ;;  %v944_v13 = vsel %vm930_vm1, %v942_v11, 0.0  ;;  %v1203_v3 = vunpack.c.0.s8 %v1202_v1 }
 0x12a   : > { %945 = vadd.xlane.f32.xlu1 %v944_v13 }
 0x12b   : > { %v943_v14 = vmul.f32 %v941_v12, %v941_v12 }
 0x12d   : > { %v947_v15 = vsel %vm930_vm1, %v943_v14, 0.0  ;;  %v5004_v14 = vsub.s32 %v1203_v3, %v1205_v4 }
 0x12e   : > { %948 = vadd.xlane.f32.xlu1 %v947_v15 }
 0x1b7   : > { %v946_v19 = vpop.xlane.xlu1 %945 }
 0x1b8   : > { %v950_v20 = vmul.f32 0.03125, %v946_v19 }
 0x1ba   : > { %v952_v21 = vadd.f32 1e-06, %v950_v20 }
 0x1bb   : > { %v949_v22 = vpop.xlane.xlu1 %948 }
 0x1bc   : > { %4287 = vrsqrt.f32 %v952_v21  ;;  %v951_v23 = vmul.f32 0.03125, %v949_v22 }
 0x1be   : > { %v953_v24 = vadd.f32 1e-06, %v951_v23 }
 0x1c0   : > { %4289 = vrsqrt.f32 %v953_v24 }
 0x1c6   : > { %v4288_v25 = vpop.eup %4287 }
 0x1c7   : > { %v956_v26 = vmul.f32 %v4288_v25, %v940_v8  ;;  %v4536_v8 = vmov 0   ;;  %v5009_v25 = vsub.s32 %v1234_v16, %v1205_v4 }
 0x1c8   : > { %v5002_v9 = vpack.i.b16 %v4536_v8, %v4536_v8 }
 0x1c9   : > { %v964_v30 = vmul.f32 %v3837_v27, %v956_v26 }
 0x1ca   : > { %v4290_v28 = vpop.eup %4289 }
 0x1cb   : > { %v957_v29 = vmul.f32 %v4290_v28, %v941_v12  ;;  %v972_v33 = vadd.f32 %v3838_v31, %v964_v30 }
 0x1cd   : > { %v965_v32 = vmul.f32 %v3837_v27, %v957_v29 }
 0x1cf   : > { %v973_v34 = vadd.f32 %v3838_v31, %v965_v32 }
 0x1d1   : > { %v974_v36 = vpack.c.bf16 %v973_v34, %v972_v33 }
 0x1d3   : > { %4002 = vmatmul.mubr.msk.bf16.vlgmr.msra.gmra.mrb[0].mxu0 %vm930_vm1, %v974_v36 }
 0x1d4   : > { %4006 = vmatpush3.bf16.msra.mxu0 %v4273_v35  ;;  %4009 = vmatprep.mubr.msk.bf16.mxu0 %vm4530_vm2, %v4529_v17 }
 0x1d5   : > { %4007 = vmatprep.subr.bf16.mxu0 %v4529_v17 }
 0x1d8   : > { %4008 = vmatpush3.bf16.msra.mxu0 %v4274_v37 }
 0x1d9   : > { %4013 = vmatprep.subr.bf16.mxu0 %v4529_v17 }
 0x1db   : > { %4010 = vmatmul.mubr.msk.bf16.vlgmr.msra.gmra.mrb[4].mxu0 %vm930_vm1, %v974_v36 }
 0x1dc   : > { %4014 = vmatpush3.bf16.msra.mxu0 %v4275_v38  ;;  %4017 = vmatprep.mubr.msk.bf16.mxu0 %vm4530_vm2, %v4529_v17 }
 0x1dd   : > { %4015 = vmatprep.subr.bf16.mxu0 %v4529_v17 }
 0x1e0   : > { %4016 = vmatpush3.bf16.msra.mxu0 %v4276_v39 }
 0x1e1   : > { %4027 = vmatprep.subr.bf16.mxu0 %v4529_v17 }
 0x1e3   : > { %4018 = vmatmul.mubr.msk.bf16.vlgmr.msra.gmra.mrb[8].mxu0 %vm930_vm1, %v974_v36 }
 0x1e4   : > { %4029 = vmatprep.mubr.msk.bf16.mxu0 %vm4530_vm2, %v4529_v17 }
 0x2a6   : > { %v1035_v41 = vpop.f32.mrb[0].mxu0 }
 0x2a7   : > { %v4003_v42 = vpop.f32.mrb[1].mxu0  ;;  %v1036_v44 = vadd.f32 %v3839_v40, %v1035_v41 }
 0x2a8   : > { %v1038_v43 = vpop.f32.mrb[2].mxu0 }
 0x2a9   : > { %v1039_v45 = vadd.f32 %v3839_v40, %v1038_v43  ;;  %v4004_v46 = vpop.f32.mrb[3].mxu0 }
 0x2ab   : > { %v4977_v47 = vpack.c.bf16 %v1039_v45, %v1036_v44 }
 0x2ad   : > { %v1182_v31 = vshrl.u32 %v4977_v47, 16 }
 0x2ae   : > { %v1099_v49 = vpop.f32.mrb[4].mxu0 }
 0x2af   : > { %v4011_v50 = vpop.f32.mrb[5].mxu0  ;;  %v1100_v52 = vadd.f32 %v3843_v48, %v1099_v49 }
 0x2b0   : > { %v1102_v51 = vpop.f32.mrb[6].mxu0 }
 0x2b1   : > { %v1103_v53 = vadd.f32 %v3843_v48, %v1102_v51  ;;  %v4012_v54 = vpop.f32.mrb[7].mxu0 }
 0x2b3   : > { %v1460_v55 = vpack.c.bf16 %v1103_v53, %v1100_v52 }
 0x2b5   : > { %1464 = vrot.lane.b32.xlu1 %v1460_v55, %s4531_s30  ;;  %1462 = vrot.lane.b32.xlu0 %v1460_v55, %s4532_s23  ;;  %v1472_v12 = vshrl.u32 %v1460_v55, 16 }
 0x2b6   : > { %v1163_v57 = vpop.f32.mrb[8].mxu0 }
 0x2b7   : > { %v4019_v58 = vpop.f32.mrb[9].mxu0  ;;  %v1164_v60 = vadd.f32 %v3847_v56, %v1163_v57 }
 0x2b8   : > { %v1166_v59 = vpop.f32.mrb[10].mxu0 }
 0x2b9   : > { %v1167_v61 = vadd.f32 %v3847_v56, %v1166_v59  ;;  %1466 = vrot.lane.b32.xlu1 %v1460_v55, %s4533_s8  ;;  %1174 = vrot.lane.b32.xlu0 %v4977_v47, %s4531_s30  ;;  %v4020_v62 = vpop.f32.mrb[11].mxu0 }
 0x2bb   : > { %v4994_v63 = vpack.c.bf16 %v1167_v61, %v1164_v60 }
 0x2bd   : > { %1172 = vrot.lane.b32.xlu1 %v4977_v47, %s4532_s23 }
 0x2c1   : > { %1176 = vrot.lane.b32.xlu1 %v4977_v47, %s4533_s8 }
 0x327   : > { %v1465_v7 = vpop.permute.xlu1 %1464  ;;  %v1463_v10 = vpop.permute.xlu0 %1462 }
 0x328   : > { %v1470_v11 = vpack.i.b16 %v1463_v10, %v1460_v55  ;;  %v1473_v13 = vshrl.u32 %v1463_v10, 16  ;;  %v1480_v22 = vshrl.u32 %v1465_v7, 16 }
 0x32a   : > { %v1474_v15 = vpack.i.b16 %v1473_v13, %v1472_v12  ;;  %v1484_v18 = vcombine.high %v1470_v11, %v5002_v9  ;;  %v1491_v24 = vrot.slane %v1470_v11, %v5004_v14 }
 0x32b   : > { %v1467_v19 = vpop.permute.xlu1 %1466  ;;  %v1175_v54 = vpop.permute.xlu0 %1174 }
 0x32c   : > { %v1550_v20 = vcombine.high %v1474_v15, %v5002_v9  ;;  %v1478_v21 = vpack.i.b16 %v1467_v19, %v1465_v7  ;;  %v1481_v23 = vshrl.u32 %v1467_v19, 16  ;;  %v1498_v28 = vrot.slane %v1484_v18, %v5004_v14 }
 0x32d   : > { %v1557_v29 = vrot.slane %v1474_v15, %v5004_v14  ;;  %v1190_v0 = vshrl.u32 %v1175_v54, 16 }
 0x32e   : > { %v1499_v26 = vcombine.high %v1478_v21, %v5002_v9  ;;  %v1506_v27 = vrot.slane %v1478_v21, %v5004_v14  ;;  %v1482_v30 = vpack.i.b16 %v1481_v23, %v1480_v22  ;;  %v1564_v33 = vrot.slane %v1550_v20, %v5004_v14 }
 0x32f   : > { %v1173_v32 = vpop.permute.xlu1 %1172 }
 0x330   : > { %v1513_v34 = vrot.slane %v1499_v26, %v5004_v14  ;;  %v1514_v35 = vcombine.low %v1491_v24, %v1506_v27  ;;  %v1515_v36 = vcombine.high %v1491_v24, %v1506_v27  ;;  %v1565_v37 = vcombine.high %v1482_v30, %v5002_v9 }
 0x331   : > { %v1572_v38 = vrot.slane %v1482_v30, %v5004_v14  ;;  %v1180_v39 = vpack.i.b16 %v1173_v32, %v4977_v47  ;;  %v1183_v40 = vshrl.u32 %v1173_v32, 16 }
 0x332   : > { %v1522_v41 = vrot.slane %v1514_v35, %v5009_v25  ;;  %v1529_v42 = vrot.slane %v1515_v36, %v5009_v25  ;;  %v1530_v43 = vcombine.low %v1498_v28, %v1513_v34  ;;  %v1531_v44 = vcombine.high %v1498_v28, %v1513_v34 }
 0x333   : > { %v1579_v45 = vrot.slane %v1565_v37, %v5004_v14  ;;  %v1580_v46 = vcombine.low %v1557_v29, %v1572_v38  ;;  %v1581_v48 = vcombine.high %v1557_v29, %v1572_v38  ;;  %v1184_v49 = vpack.i.b16 %v1183_v40, %v1182_v31  ;;  %v1177_v60 = vpop.permute.xlu1 %1176 }
 0x334   : > { %v1538_v50 = vrot.slane %v1530_v43, %v5009_v25  ;;  %v1545_v51 = vrot.slane %v1531_v44, %v5009_v25  ;;  %v1616_v52 = vcombine.low %v1522_v41, %v1529_v42  ;;  %v3863_v53 = vcombine.high %v1522_v41, %v1529_v42 }
 0x335   : > { %v1588_v47 = vrot.slane %v1580_v46, %v5009_v25  ;;  %v1595_v55 = vrot.slane %v1581_v48, %v5009_v25  ;;  %v1596_v56 = vcombine.low %v1564_v33, %v1579_v45  ;;  %v1597_v57 = vcombine.high %v1564_v33, %v1579_v45 }
 0x336   : > { %v1632_v58 = vcombine.low %v1538_v50, %v1545_v51  ;;  %v3864_v59 = vcombine.high %v1538_v50, %v1545_v51  ;;  %v5031_v1 = vrot.slane %v1616_v52, %v5004_v14  ;;  %v5034_v2 = vrot.slane %v3863_v53, %v5004_v14 }
 0x337   : > { %v1604_v61 = vrot.slane %v1596_v56, %v5009_v25  ;;  %v1611_v62 = vrot.slane %v1597_v57, %v5009_v25  ;;  %v1200_v3 = vcombine.high %v1180_v39, %v5002_v9  ;;  %v1266_v4 = vcombine.high %v1184_v49, %v5002_v9 }
 0x338   : > { %v1666_v5 = vcombine.low %v1588_v47, %v1595_v55  ;;  %v3865_v6 = vcombine.high %v1588_v47, %v1595_v55  ;;  %v1188_v7 = vpack.i.b16 %v1177_v60, %v1175_v54  ;;  %v1191_v10 = vshrl.u32 %v1177_v60, 16 }
 0x339   : > { %v1207_v11 = vrot.slane %v1180_v39, %v5004_v14  ;;  %v1273_v12 = vrot.slane %v1184_v49, %v5004_v14  ;;  %v1639_v13 = vrot.slane %v1632_v58, %v5004_v14  ;;  %v1647_v15 = vrot.slane %v3864_v59, %v5004_v14 }
 0x33a   : > { %v1682_v16 = vcombine.low %v1604_v61, %v1611_v62  ;;  %v1192_v18 = vpack.i.b16 %v1191_v10, %v1190_v0  ;;  %v1215_v19 = vcombine.high %v1188_v7, %v5002_v9  ;;  %v1222_v20 = vrot.slane %v1188_v7, %v5004_v14 }
 0x33b   : > { %v3866_v21 = vcombine.high %v1604_v61, %v1611_v62  ;;  %v1214_v22 = vrot.slane %v1200_v3, %v5004_v14  ;;  %v1280_v23 = vrot.slane %v1266_v4, %v5004_v14  ;;  %v1648_v24 = vcombine.low %v5031_v1, %v5034_v2 }
 0x33c   : > { %v1229_v26 = vrot.slane %v1215_v19, %v5004_v14  ;;  %v1230_v27 = vcombine.low %v1207_v11, %v1222_v20  ;;  %v1231_v28 = vcombine.high %v1207_v11, %v1222_v20  ;;  %v1281_v29 = vcombine.high %v1192_v18, %v5002_v9 }
 0x33d   : > { %v1288_v30 = vrot.slane %v1192_v18, %v5004_v14  ;;  %v1656_v31 = vcombine.low %v1639_v13, %v1647_v15  ;;  %v1673_v32 = vrot.slane %v1666_v5, %v5004_v14  ;;  %v1681_v33 = vrot.slane %v3865_v6, %v5004_v14 }
 0x33e   : > { %v1238_v34 = vrot.slane %v1230_v27, %v5009_v25  ;;  %v1245_v35 = vrot.slane %v1231_v28, %v5009_v25  ;;  %v1246_v36 = vcombine.low %v1214_v22, %v1229_v26  ;;  %v1247_v37 = vcombine.high %v1214_v22, %v1229_v26 }
 0x33f   : > { %v1295_v38 = vrot.slane %v1281_v29, %v5004_v14  ;;  %v1296_v39 = vcombine.low %v1273_v12, %v1288_v30  ;;  %v1297_v40 = vcombine.high %v1273_v12, %v1288_v30  ;;  %v1689_v41 = vrot.slane %v1682_v16, %v5004_v14 }
 0x340   : > { %v1254_v42 = vrot.slane %v1246_v36, %v5009_v25  ;;  %v1261_v43 = vrot.slane %v1247_v37, %v5009_v25  ;;  %v1332_v44 = vcombine.low %v1238_v34, %v1245_v35  ;;  %v3851_v45 = vcombine.high %v1238_v34, %v1245_v35 }
 0x341   : > { %v1304_v46 = vrot.slane %v1296_v39, %v5009_v25  ;;  %v1311_v48 = vrot.slane %v1297_v40, %v5009_v25  ;;  %v1312_v49 = vcombine.low %v1280_v23, %v1295_v38  ;;  %v1313_v50 = vcombine.high %v1280_v23, %v1295_v38 }
 0x342   : > { %v1339_v51 = vrot.slane %v1332_v44, %v5004_v14  ;;  %v1348_v52 = vcombine.low %v1254_v42, %v1261_v43  ;;  %v3852_v53 = vcombine.high %v1254_v42, %v1261_v43  ;;  %v1697_v54 = vrot.slane %v3866_v21, %v5004_v14 }
 0x343   : > { %v1320_v47 = vrot.slane %v1312_v49, %v5009_v25  ;;  %v1327_v55 = vrot.slane %v1313_v50, %v5009_v25  ;;  %v1382_v56 = vcombine.low %v1304_v46, %v1311_v48  ;;  %v3853_v57 = vcombine.high %v1304_v46, %v1311_v48 }
 0x344   : > { %v1347_v58 = vrot.slane %v3851_v45, %v5004_v14  ;;  %v1355_v59 = vrot.slane %v1348_v52, %v5004_v14  ;;  %v1363_v60 = vrot.slane %v3852_v53, %v5004_v14  ;;  %v1698_v61 = vcombine.low %v1673_v32, %v1681_v33 }
 0x345   : > { %v1389_v62 = vrot.slane %v1382_v56, %v5004_v14  ;;  %v1397_v0 = vrot.slane %v3853_v57, %v5004_v14  ;;  %v1398_v1 = vcombine.low %v1320_v47, %v1327_v55  ;;  %v3854_v2 = vcombine.high %v1320_v47, %v1327_v55 }
 0x346   : > { %v1663_v3 = vrot.slane %v1656_v31, %v5009_v25  ;;  %v1706_v4 = vcombine.low %v1689_v41, %v1697_v54  ;;  %v1372_v7 = vcombine.low %v1355_v59, %v1363_v60  ;;  %v1364_v11 = vcombine.low %v1339_v51, %v1347_v58 }
 0x347   : > { %v1405_v5 = vrot.slane %v1398_v1, %v5004_v14  ;;  %v1413_v6 = vrot.slane %v3854_v2, %v5004_v14  ;;  %v1414_v10 = vcombine.low %v1389_v62, %v1397_v0  ;;  %v1655_v12 = vrot.slane %v1648_v24, %v5009_v25 }
 0x348   : > { %v1705_v13 = vrot.slane %v1698_v61, %v5009_v25  ;;  %v1713_v15 = vrot.slane %v1706_v4, %v5009_v25  ;;  %v1379_v20 = vrot.slane %v1372_v7, %v5009_v25  ;;  %v1371_v27 = vrot.slane %v1364_v11, %v5009_v25 }
 0x349   : > { %v1422_v16 = vcombine.low %v1405_v5, %v1413_v6  ;;  %v1664_v18 = vcombine.low %v1655_v12, %v1663_v3  ;;  %v1421_v21 = vrot.slane %v1414_v10, %v5009_v25  ;;  %v1665_v42 = vcombine.high %v1655_v12, %v1663_v3 }
 0x34a   : > { %v1714_v19 = vcombine.low %v1705_v13, %v1713_v15  ;;  %v1380_v31 = vcombine.low %v1371_v27, %v1379_v20  ;;  %v1715_v36 = vcombine.high %v1705_v13, %v1713_v15  ;;  %v1381_v55 = vcombine.high %v1371_v27, %v1379_v20 }
 0x34b   : > { %v1429_v22 = vrot.slane %v1422_v16, %v5009_v25  ;;  %v1719_v24 = vshrl.u32 %v1664_v18, 16  ;;  %v1725_v47 = vshrl.u32 %v1665_v42, 16 }
 0x34c   : > { %v1718_v23 = vpack.i.b16 %v1714_v19, %v1664_v18  ;;  %v1720_v26 = vshrl.u32 %v1714_v19, 16  ;;  %v1435_v43 = vshrl.u32 %v1380_v31, 16  ;;  %v1724_v46 = vpack.i.b16 %v1715_v36, %v1665_v42 }
 0x34d   : > { %v1430_v28 = vcombine.low %v1421_v21, %v1429_v22  ;;  %v1726_v51 = vshrl.u32 %v1715_v36, 16  ;;  %v1431_v52 = vcombine.high %v1421_v21, %v1429_v22  ;;  %v1441_v4 = vshrl.u32 %v1381_v55, 16 }
 0x34e   : > { %v3867_v29 = vcombine.low %v1718_v23, %v1718_v23  ;;  %v3868_v30 = vcombine.high %v1718_v23, %v1718_v23  ;;  %v1721_v35 = vpack.i.b16 %v1720_v26, %v1719_v24  ;;  %v3871_v49 = vcombine.low %v1724_v46, %v1724_v46 }
 0x34f   : > { %v1434_v34 = vpack.i.b16 %v1430_v28, %v1380_v31  ;;  %v1436_v41 = vshrl.u32 %v1430_v28, 16  ;;  %v3872_v50 = vcombine.high %v1724_v46, %v1724_v46  ;;  %v1727_v58 = vpack.i.b16 %v1726_v51, %v1725_v47 }
 0x350   : > { %v2033_v32 = vsel %vm2028_vm3, %v3867_v29, 0  ;;  %v2079_v33 = vsel %vm2028_vm3, %v3868_v30, 0  ;;  %v3869_v39 = vcombine.low %v1721_v35, %v1721_v35  ;;  %v3870_v40 = vcombine.high %v1721_v35, %v1721_v35 }
 0x351   : > { %4022 = vmatpush3.bf16.xpose.msra.mxu1 %v2033_v32  ;;  %4028 = vmatpush3.bf16.xpose.msra.mxu0 %v2079_v33  ;;  %v3855_v37 = vcombine.low %v1434_v34, %v1434_v34  ;;  %v3856_v38 = vcombine.high %v1434_v34, %v1434_v34  ;;  %v1437_v48 = vpack.i.b16 %v1436_v41, %v1435_v43  ;;  %v2217_v56 = vsel %vm2028_vm3, %v3871_v49, 0 }
 0x352   : > { %4033 = vmatprep.subr.bf16.mxu1 %v4529_v17  ;;  %4039 = vmatprep.subr.bf16.mxu0 %v4529_v17  ;;  %v2125_v44 = vsel %vm2028_vm3, %v3869_v39, 0  ;;  %v2171_v45 = vsel %vm2028_vm3, %v3870_v40, 0  ;;  %v2263_v57 = vsel %vm2028_vm3, %v3872_v50, 0  ;;  %v1440_v59 = vpack.i.b16 %v1431_v52, %v1381_v55 }
 0x353   : > { %v3857_v53 = vcombine.low %v1437_v48, %v1437_v48  ;;  %v3858_v54 = vcombine.high %v1437_v48, %v1437_v48  ;;  %v3873_v60 = vcombine.low %v1727_v58, %v1727_v58  ;;  %v3874_v61 = vcombine.high %v1727_v58, %v1727_v58 }
 0x354   : > { %v3859_v62 = vcombine.low %v1440_v59, %v1440_v59  ;;  %v3860_v0 = vcombine.high %v1440_v59, %v1440_v59  ;;  %v1442_v1 = vshrl.u32 %v1431_v52, 16 }
 0x355   : > { %v2309_v2 = vsel %vm2028_vm3, %v3873_v60, 0  ;;  %v2355_v3 = vsel %vm2028_vm3, %v3874_v61, 0 }
 0x356   : > { %v1443_v5 = vpack.i.b16 %v1442_v1, %v1441_v4 }
 0x358   : > { %4024 = vmatmul.mubr.msk.bf16.vlgmr.msra.gmra.mrb[0].mxu1 %vm2028_vm3, %v3855_v37  ;;  %4030 = vmatmul.mubr.msk.bf16.vlgmr.msra.gmra.mrb[12].mxu0 %vm2028_vm3, %v3856_v38  ;;  %v3861_v6 = vcombine.low %v1443_v5, %v1443_v5  ;;  %v3862_v7 = vcombine.high %v1443_v5, %v1443_v5 }
 0x359   : > { %4034 = vmatpush3.bf16.xpose.msra.mxu1 %v2125_v44  ;;  %4040 = vmatpush3.bf16.xpose.msra.mxu0 %v2171_v45 }
 0x35a   : > { %4035 = vmatprep.mubr.msk.bf16.mxu1 %vm4530_vm2, %v4529_v17  ;;  %4041 = vmatprep.mubr.msk.bf16.mxu0 %vm4530_vm2, %v4529_v17 }
 0x35b   : > { %4045 = vmatprep.subr.bf16.mxu1 %v4529_v17  ;;  %4051 = vmatprep.subr.bf16.mxu0 %v4529_v17 }
 0x360   : > { %4036 = vmatmul.mubr.msk.bf16.vlgmr.msra.gmra.mrb[4].mxu1 %vm2028_vm3, %v3857_v53  ;;  %4042 = vmatmul.mubr.msk.bf16.vlgmr.msra.gmra.mrb[16].mxu0 %vm2028_vm3, %v3858_v54 }
 0x361   : > { %4046 = vmatpush3.bf16.xpose.msra.mxu1 %v2217_v56  ;;  %4052 = vmatpush3.bf16.xpose.msra.mxu0 %v2263_v57 }
 0x362   : > { %4047 = vmatprep.mubr.msk.bf16.mxu1 %vm4530_vm2, %v4529_v17  ;;  %4053 = vmatprep.mubr.msk.bf16.mxu0 %vm4530_vm2, %v4529_v17 }
 0x363   : > { %4057 = vmatprep.subr.bf16.mxu1 %v4529_v17  ;;  %4063 = vmatprep.subr.bf16.mxu0 %v4529_v17 }
 0x368   : > { %4048 = vmatmul.mubr.msk.bf16.vlgmr.msra.gmra.mrb[8].mxu1 %vm2028_vm3, %v3859_v62  ;;  %4054 = vmatmul.mubr.msk.bf16.vlgmr.msra.gmra.mrb[20].mxu0 %vm2028_vm3, %v3860_v0 }
 0x369   : > { %4058 = vmatpush3.bf16.xpose.msra.mxu1 %v2309_v2  ;;  %4064 = vmatpush3.bf16.xpose.msra.mxu0 %v2355_v3 }
 0x36a   : > { %4059 = vmatprep.mubr.msk.bf16.mxu1 %vm4530_vm2, %v4529_v17  ;;  %4065 = vmatprep.mubr.msk.bf16.mxu0 %vm4530_vm2, %v4529_v17 }
 0x36b   : > { %4069 = vmatprep.subr.bf16.mxu1 %v4529_v17  ;;  %4075 = vmatprep.subr.bf16.mxu0 %v4529_v17 }
 0x370   : > { %4060 = vmatmul.mubr.msk.bf16.vlgmr.msra.gmra.mrb[12].mxu1 %vm2028_vm3, %v3861_v6  ;;  %4066 = vmatmul.mubr.msk.bf16.vlgmr.msra.gmra.mrb[24].mxu0 %vm2028_vm3, %v3862_v7 }
 0x371   : > { %4071 = vmatprep.mubr.msk.bf16.mxu1 %vm4530_vm2, %v4529_v17  ;;  %4077 = vmatprep.mubr.msk.bf16.mxu0 %vm4530_vm2, %v4529_v17 }
 0x42b   : > { %v2069_v10 = vpop.f32.mrb[0].mxu1  ;;  %v2115_v11 = vpop.f32.mrb[12].mxu0 }
 0x42c   : > { %v2397_v12 = vmul.f32 0.35355338, %v2069_v10  ;;  %v2398_v13 = vmul.f32 0.35355338, %v2115_v11  ;;  %v4025_v15 = vpop.f32.mrb[1].mxu1  ;;  %v4031_v16 = vpop.f32.mrb[13].mxu0 }
 0x42d   : > { %v2072_v18 = vpop.f32.mrb[2].mxu1  ;;  %v2118_v19 = vpop.f32.mrb[14].mxu0 }
 0x42e   : > { %v4026_v20 = vpop.f32.mrb[3].mxu1  ;;  %v4032_v21 = vpop.f32.mrb[15].mxu0  ;;  %v2405_v22 = vsel %vm2028_vm3, %v2397_v12, -inf  ;;  %v2408_v23 = vsel %vm2028_vm3, %v2398_v13, -inf }
 0x42f   : > { %2406 = vmax.xlane.f32.xlu0 %v2405_v22  ;;  %2409 = vmax.xlane.f32.xlu1 %v2408_v23 }
 0x433   : > { %v2161_v26 = vpop.f32.mrb[4].mxu1  ;;  %v2207_v27 = vpop.f32.mrb[16].mxu0 }
 0x434   : > { %v2399_v28 = vmul.f32 0.35355338, %v2161_v26  ;;  %v4037_v24 = vpop.f32.mrb[5].mxu1  ;;  %v4043_v29 = vpop.f32.mrb[17].mxu0  ;;  %v2400_v32 = vmul.f32 0.35355338, %v2207_v27 }
 0x435   : > { %v2164_v30 = vpop.f32.mrb[6].mxu1  ;;  %v2210_v31 = vpop.f32.mrb[18].mxu0 }
 0x436   : > { %v4038_v33 = vpop.f32.mrb[7].mxu1  ;;  %v4044_v34 = vpop.f32.mrb[19].mxu0  ;;  %v2411_v35 = vsel %vm2028_vm3, %v2399_v28, -inf  ;;  %v2414_v36 = vsel %vm2028_vm3, %v2400_v32, -inf }
 0x437   : > { %2412 = vmax.xlane.f32.xlu0 %v2411_v35 }
 0x43b   : > { %v2253_v37 = vpop.f32.mrb[8].mxu1  ;;  %2415 = vmax.xlane.f32.xlu0 %v2414_v36  ;;  %v2299_v38 = vpop.f32.mrb[20].mxu0 }
 0x43c   : > { %v2401_v39 = vmul.f32 0.35355338, %v2253_v37  ;;  %v2402_v40 = vmul.f32 0.35355338, %v2299_v38  ;;  %v4049_v41 = vpop.f32.mrb[9].mxu1  ;;  %v4055_v42 = vpop.f32.mrb[21].mxu0 }
 0x43d   : > { %v2256_v43 = vpop.f32.mrb[10].mxu1  ;;  %v2302_v44 = vpop.f32.mrb[22].mxu0  ;;  %v1756_v37 = vshrl.u32 %v4994_v63, 16 }
 0x43e   : > { %v4050_v45 = vpop.f32.mrb[11].mxu1  ;;  %v4056_v46 = vpop.f32.mrb[23].mxu0  ;;  %v2417_v48 = vsel %vm2028_vm3, %v2401_v39, -inf  ;;  %v2420_v49 = vsel %vm2028_vm3, %v2402_v40, -inf }
 0x43f   : > { %2418 = vmax.xlane.f32.xlu0 %v2417_v48  ;;  %2421 = vmax.xlane.f32.xlu1 %v2420_v49 }
 0x443   : > { %v2345_v50 = vpop.f32.mrb[12].mxu1  ;;  %v2391_v51 = vpop.f32.mrb[24].mxu0 }
 0x444   : > { %v2403_v52 = vmul.f32 0.35355338, %v2345_v50  ;;  %v2404_v53 = vmul.f32 0.35355338, %v2391_v51  ;;  %v4061_v54 = vpop.f32.mrb[13].mxu1  ;;  %v4067_v47 = vpop.f32.mrb[25].mxu0 }
 0x445   : > { %v2348_v55 = vpop.f32.mrb[14].mxu1  ;;  %v2394_v56 = vpop.f32.mrb[26].mxu0 }
 0x446   : > { %v4062_v57 = vpop.f32.mrb[15].mxu1  ;;  %v4068_v58 = vpop.f32.mrb[27].mxu0  ;;  %v2423_v59 = vsel %vm2028_vm3, %v2403_v52, -inf  ;;  %v2426_v60 = vsel %vm2028_vm3, %v2404_v53, -inf }
 0x447   : > { %2424 = vmax.xlane.f32.xlu0 %v2423_v59  ;;  %2427 = vmax.xlane.f32.xlu1 %v2426_v60 }
 0x458   : > { %1748 = vrot.lane.b32.xlu1 %v4994_v63, %s4531_s30 }
 0x45c   : > { %1750 = vrot.lane.b32.xlu1 %v4994_v63, %s4533_s8 }
 0x45d   : > { %1746 = vrot.lane.b32.xlu0 %v4994_v63, %s4532_s23 }
 0x4bc   : > { %v2407_v61 = vpop.xlane.xlu0 %2406  ;;  %v2410_v62 = vpop.xlane.xlu1 %2409 }
 0x4bd   : > { %v2429_v0 = vsub.f32 %v2397_v12, %v2407_v61  ;;  %v2430_v1 = vsub.f32 %v2398_v13, %v2410_v62 }
 0x4bf   : > { %v2437_v2 = vmul.f32 1.442695, %v2429_v0  ;;  %v2439_v3 = vmul.f32 1.442695, %v2430_v1 }
 0x4c1   : > { %4291 = vpow2.f32 %v2437_v2 }
 0x4c2   : > { %4293 = vpow2.f32 %v2439_v3 }
 0x4c4   : > { %v2413_v4 = vpop.xlane.xlu0 %2412 }
 0x4c5   : > { %v2431_v5 = vsub.f32 %v2399_v28, %v2413_v4 }
 0x4c7   : > { %v2441_v6 = vmul.f32 1.442695, %v2431_v5 }
 0x4c8   : > { %v2416_v7 = vpop.xlane.xlu0 %2415 }
 0x4c9   : > { %4295 = vpow2.f32 %v2441_v6  ;;  %v2432_v10 = vsub.f32 %v2400_v32, %v2416_v7 }
 0x4cb   : > { %v5134_v11 = vpop.eup %4291  ;;  %v2443_v15 = vmul.f32 1.442695, %v2432_v10 }
 0x4cc   : > { %v5136_v16 = vpop.eup %4293  ;;  %v2419_v18 = vpop.xlane.xlu0 %2418  ;;  %v2453_v12 = vsel %vm2028_vm3, %v5134_v11, 0.0 }
 0x4cd   : > { %v2422_v19 = vpop.xlane.xlu1 %2421  ;;  %4297 = vpow2.f32 %v2443_v15  ;;  %v2433_v13 = vsub.f32 %v2401_v39, %v2419_v18  ;;  %v2456_v21 = vsel %vm2028_vm3, %v5136_v16, 0.0  ;;  %2454 = vadd.xlane.f32.xlu1 %v2453_v12 }
 0x4ce   : > { %v2434_v20 = vsub.f32 %v2402_v40, %v2422_v19  ;;  %2457 = vadd.xlane.f32.xlu0 %v2456_v21 }
 0x4cf   : > { %v2445_v22 = vmul.f32 1.442695, %v2433_v13 }
 0x4d0   : > { %v2447_v23 = vmul.f32 1.442695, %v2434_v20 }
 0x4d1   : > { %4299 = vpow2.f32 %v2445_v22 }
 0x4d2   : > { %4301 = vpow2.f32 %v2447_v23 }
 0x4d3   : > { %v5142_v26 = vpop.eup %4295 }
 0x4d4   : > { %v2425_v27 = vpop.xlane.xlu0 %2424  ;;  %v2428_v28 = vpop.xlane.xlu1 %2427  ;;  %v2459_v24 = vsel %vm2028_vm3, %v5142_v26, 0.0 }
 0x4d5   : > { %v2435_v29 = vsub.f32 %v2403_v52, %v2425_v27  ;;  %v2436_v30 = vsub.f32 %v2404_v53, %v2428_v28  ;;  %2460 = vadd.xlane.f32.xlu0 %v2459_v24 }
 0x4d7   : > { %v5146_v31 = vpop.eup %4297  ;;  %v2449_v32 = vmul.f32 1.442695, %v2435_v29  ;;  %v2451_v33 = vmul.f32 1.442695, %v2436_v30 }
 0x4d8   : > { %v1747_v34 = vpop.permute.xlu0 %1746  ;;  %v1749_v35 = vpop.permute.xlu1 %1748  ;;  %v2462_v36 = vsel %vm2028_vm3, %v5146_v31, 0.0 }
 0x4d9   : > { %4303 = vpow2.f32 %v2449_v32  ;;  %v1754_v38 = vpack.i.b16 %v1747_v34, %v4994_v63  ;;  %v1757_v39 = vshrl.u32 %v1747_v34, 16  ;;  %2463 = vadd.xlane.f32.xlu0 %v2462_v36  ;;  %v1764_v49 = vshrl.u32 %v1749_v35, 16 }
 0x4da   : > { %4305 = vpow2.f32 %v2451_v33 }
 0x4db   : > { %v5152_v40 = vpop.eup %4299  ;;  %v1758_v41 = vpack.i.b16 %v1757_v39, %v1756_v37  ;;  %v1768_v45 = vcombine.high %v1754_v38, %v5002_v9  ;;  %v1775_v51 = vrot.slane %v1754_v38, %v5004_v14 }
 0x4dc   : > { %v5154_v42 = vpop.eup %4301  ;;  %v1751_v43 = vpop.permute.xlu1 %1750  ;;  %v2465_v44 = vsel %vm2028_vm3, %v5152_v40, 0.0 }
 0x4dd   : > { %v1762_v46 = vpack.i.b16 %v1751_v43, %v1749_v35  ;;  %2466 = vadd.xlane.f32.xlu1 %v2465_v44  ;;  %v1834_v48 = vcombine.high %v1758_v41, %v5002_v9  ;;  %v1765_v63 = vshrl.u32 %v1751_v43, 16  ;;  %v2468_v50 = vsel %vm2028_vm3, %v5154_v42, 0.0 }
 0x4de   : > { %2469 = vadd.xlane.f32.xlu0 %v2468_v50  ;;  %v1782_v47 = vrot.slane %v1768_v45, %v5004_v14  ;;  %v1841_v58 = vrot.slane %v1758_v41, %v5004_v14 }
 0x4df   : > { %v1783_v52 = vcombine.high %v1762_v46, %v5002_v9  ;;  %v1790_v53 = vrot.slane %v1762_v46, %v5004_v14  ;;  %v1766_v54 = vpack.i.b16 %v1765_v63, %v1764_v49  ;;  %v1848_v59 = vrot.slane %v1834_v48, %v5004_v14 }
 0x4e1   : > { %v1797_v55 = vrot.slane %v1783_v52, %v5004_v14  ;;  %v1798_v56 = vcombine.low %v1775_v51, %v1790_v53  ;;  %v1799_v57 = vcombine.high %v1775_v51, %v1790_v53  ;;  %v1849_v60 = vcombine.high %v1766_v54, %v5002_v9 }
 0x4e2   : > { %v1856_v61 = vrot.slane %v1766_v54, %v5004_v14 }
 0x4e3   : > { %v5171_v62 = vpop.eup %4303  ;;  %v1806_v0 = vrot.slane %v1798_v56, %v5009_v25  ;;  %v1813_v1 = vrot.slane %v1799_v57, %v5009_v25  ;;  %v1814_v2 = vcombine.low %v1782_v47, %v1797_v55  ;;  %v1815_v3 = vcombine.high %v1782_v47, %v1797_v55 }
 0x4e4   : > { %v1863_v4 = vrot.slane %v1849_v60, %v5004_v14  ;;  %v1864_v5 = vcombine.low %v1841_v58, %v1856_v61  ;;  %v1865_v6 = vcombine.high %v1841_v58, %v1856_v61  ;;  %v2471_v7 = vsel %vm2028_vm3, %v5171_v62, 0.0  ;;  %v5180_v19 = vpop.eup %4305 }
 0x4e5   : > { %v1822_v10 = vrot.slane %v1814_v2, %v5009_v25  ;;  %v1829_v9 = vrot.slane %v1815_v3, %v5009_v25  ;;  %v1900_v15 = vcombine.low %v1806_v0, %v1813_v1  ;;  %v3875_v18 = vcombine.high %v1806_v0, %v1813_v1  ;;  %2472 = vadd.xlane.f32.xlu1 %v2471_v7 }
 0x4e6   : > { %v1872_v12 = vrot.slane %v1864_v5, %v5009_v25  ;;  %v1879_v13 = vrot.slane %v1865_v6, %v5009_v25  ;;  %v1880_v20 = vcombine.low %v1848_v59, %v1863_v4  ;;  %v1881_v21 = vcombine.high %v1848_v59, %v1863_v4 }
 0x4e7   : > { %v1907_v22 = vrot.slane %v1900_v15, %v5004_v14  ;;  %v1915_v23 = vrot.slane %v3875_v18, %v5004_v14  ;;  %v1916_v27 = vcombine.low %v1822_v10, %v1829_v9  ;;  %v3876_v28 = vcombine.high %v1822_v10, %v1829_v9 }
 0x4e8   : > { %v1888_v24 = vrot.slane %v1880_v20, %v5009_v25  ;;  %v1895_v29 = vrot.slane %v1881_v21, %v5009_v25  ;;  %v1950_v30 = vcombine.low %v1872_v12, %v1879_v13  ;;  %v3877_v32 = vcombine.high %v1872_v12, %v1879_v13 }
 0x4e9   : > { %v1923_v33 = vrot.slane %v1916_v27, %v5004_v14  ;;  %v1931_v34 = vrot.slane %v3876_v28, %v5004_v14  ;;  %v2474_v35 = vsel %vm2028_vm3, %v5180_v19, 0.0  ;;  %v1932_v36 = vcombine.low %v1907_v22, %v1915_v23 }
 0x4ea   : > { %v1957_v37 = vrot.slane %v1950_v30, %v5004_v14  ;;  %v1965_v38 = vrot.slane %v3877_v32, %v5004_v14  ;;  %v1966_v39 = vcombine.low %v1888_v24, %v1895_v29  ;;  %v3878_v41 = vcombine.high %v1888_v24, %v1895_v29  ;;  %2475 = vadd.xlane.f32.xlu0 %v2474_v35 }
 0x4eb   : > { %v1940_v43 = vcombine.low %v1923_v33, %v1931_v34  ;;  %v1939_v48 = vrot.slane %v1932_v36, %v5009_v25 }
 0x4ec   : > { %v1973_v44 = vrot.slane %v1966_v39, %v5004_v14  ;;  %v1981_v45 = vrot.slane %v3878_v41, %v5004_v14  ;;  %v1982_v46 = vcombine.low %v1957_v37, %v1965_v38 }
 0x4ed   : > { %v1947_v49 = vrot.slane %v1940_v43, %v5009_v25 }
 0x4ee   : > { %v1990_v63 = vcombine.low %v1973_v44, %v1981_v45  ;;  %v1989_v52 = vrot.slane %v1982_v46, %v5009_v25 }
 0x4ef   : > { %v1948_v50 = vcombine.low %v1939_v48, %v1947_v49  ;;  %v1949_v51 = vcombine.high %v1939_v48, %v1947_v49 }
 0x4f0   : > { %v1997_v53 = vrot.slane %v1990_v63, %v5009_v25 }
 0x4f1   : > { %v2003_v55 = vshrl.u32 %v1948_v50, 16  ;;  %v2009_v60 = vshrl.u32 %v1949_v51, 16 }
 0x4f2   : > { %v1998_v54 = vcombine.low %v1989_v52, %v1997_v53  ;;  %v1999_v47 = vcombine.high %v1989_v52, %v1997_v53 }
 0x4f4   : > { %v2002_v56 = vpack.i.b16 %v1998_v54, %v1948_v50  ;;  %v2004_v57 = vshrl.u32 %v1998_v54, 16  ;;  %v2008_v58 = vpack.i.b16 %v1999_v47, %v1949_v51  ;;  %v2010_v59 = vshrl.u32 %v1999_v47, 16 }
 0x4f6   : > { %v3879_v61 = vcombine.low %v2002_v56, %v2002_v56  ;;  %v3880_v0 = vcombine.high %v2002_v56, %v2002_v56  ;;  %v2005_v1 = vpack.i.b16 %v2004_v57, %v2003_v55  ;;  %v3883_v2 = vcombine.low %v2008_v58, %v2008_v58 }
 0x4f7   : > { %v3884_v3 = vcombine.high %v2008_v58, %v2008_v58  ;;  %v2011_v4 = vpack.i.b16 %v2010_v59, %v2009_v60 }
 0x4f8   : > { %v2506_v5 = vsel %vm2504_vm4, %v3879_v61, 0  ;;  %v2552_v6 = vsel %vm2504_vm4, %v3880_v0, 0  ;;  %v3881_v7 = vcombine.low %v2005_v1, %v2005_v1  ;;  %v3882_v10 = vcombine.high %v2005_v1, %v2005_v1 }
 0x4f9   : > { %4070 = vmatpush3.bf16.msra.mxu1 %v2506_v5  ;;  %4076 = vmatpush3.bf16.msra.mxu0 %v2552_v6  ;;  %v2690_v9 = vsel %vm2504_vm4, %v3883_v2, 0  ;;  %v2736_v15 = vsel %vm2504_vm4, %v3884_v3, 0  ;;  %v3885_v18 = vcombine.low %v2011_v4, %v2011_v4  ;;  %v3886_v12 = vcombine.high %v2011_v4, %v2011_v4 }
 0x4fa   : > { %4081 = vmatprep.subr.bf16.mxu1 %v4529_v17  ;;  %4087 = vmatprep.subr.bf16.mxu0 %v4529_v17  ;;  %v2598_v13 = vsel %vm2504_vm4, %v3881_v7, 0  ;;  %v2644_v20 = vsel %vm2504_vm4, %v3882_v10, 0 }
 0x4fb   : > { %v2782_v21 = vsel %vm2504_vm4, %v3885_v18, 0  ;;  %v2828_v22 = vsel %vm2504_vm4, %v3886_v12, 0 }
 0x55a   : > { %v2455_v23 = vpop.xlane.xlu1 %2454 }
 0x55b   : > { %v2458_v27 = vpop.xlane.xlu0 %2457  ;;  %4307 = vrcp.f32 %v2455_v23 }
 0x55c   : > { %4309 = vrcp.f32 %v2458_v27 }
 0x562   : > { %v2461_v28 = vpop.xlane.xlu0 %2460 }
 0x563   : > { %4311 = vrcp.f32 %v2461_v28 }
 0x565   : > { %v4308_v24 = vpop.eup %4307 }
 0x566   : > { %v4310_v29 = vpop.eup %4309  ;;  %v2485_v30 = vmul.f32 %v4308_v24, %v5134_v11  ;;  %v2464_v32 = vpop.xlane.xlu0 %2463 }
 0x567   : > { %v2486_v33 = vmul.f32 %v4310_v29, %v5136_v16  ;;  %4313 = vrcp.f32 %v2464_v32 }
 0x568   : > { %v2493_v34 = vpack.c.bf16 %v2485_v30, %v2485_v30 }
 0x569   : > { %v2494_v35 = vpack.c.bf16 %v2486_v33, %v2486_v33 }
 0x56a   : > { %4072 = vmatmul.mubr.msk.bf16.vlgmr.msra.gmra.mrb[16].mxu1 %vm2028_vm3, %v2493_v34  ;;  %v2467_v36 = vpop.xlane.xlu1 %2466 }
 0x56b   : > { %4078 = vmatmul.mubr.msk.bf16.vlgmr.msra.gmra.mrb[28].mxu0 %vm2028_vm3, %v2494_v35  ;;  %4082 = vmatpush3.bf16.msra.mxu1 %v2598_v13  ;;  %4315 = vrcp.f32 %v2467_v36  ;;  %v2470_v37 = vpop.xlane.xlu0 %2469 }
 0x56c   : > { %4088 = vmatpush3.bf16.msra.mxu0 %v2644_v20  ;;  %4083 = vmatprep.mubr.msk.bf16.mxu1 %vm4530_vm2, %v4529_v17  ;;  %4317 = vrcp.f32 %v2470_v37 }
 0x56d   : > { %v4312_v38 = vpop.eup %4311  ;;  %4093 = vmatprep.subr.bf16.mxu1 %v4529_v17  ;;  %4089 = vmatprep.mubr.msk.bf16.mxu0 %vm4530_vm2, %v4529_v17 }
 0x56e   : > { %v2487_v11 = vmul.f32 %v4312_v38, %v5142_v26  ;;  %4099 = vmatprep.subr.bf16.mxu0 %v4529_v17 }
 0x570   : > { %v2495_v16 = vpack.c.bf16 %v2487_v11, %v2487_v11 }
 0x571   : > { %v4314_v39 = vpop.eup %4313 }
 0x572   : > { %v2488_v41 = vmul.f32 %v4314_v39, %v5146_v31  ;;  %4084 = vmatmul.mubr.msk.bf16.vlgmr.msra.gmra.mrb[20].mxu1 %vm2028_vm3, %v2495_v16  ;;  %v2473_v43 = vpop.xlane.xlu1 %2472 }
 0x573   : > { %4094 = vmatpush3.bf16.msra.mxu1 %v2690_v9  ;;  %4319 = vrcp.f32 %v2473_v43  ;;  %4095 = vmatprep.mubr.msk.bf16.mxu1 %vm4530_vm2, %v4529_v17 }
 0x574   : > { %v2496_v44 = vpack.c.bf16 %v2488_v41, %v2488_v41  ;;  %4105 = vmatprep.subr.bf16.mxu1 %v4529_v17 }
 0x575   : > { %v4316_v45 = vpop.eup %4315 }
 0x576   : > { %v2489_v26 = vmul.f32 %v4316_v45, %v5152_v40  ;;  %4090 = vmatmul.mubr.msk.bf16.vlgmr.msra.gmra.mrb[32].mxu0 %vm2028_vm3, %v2496_v44  ;;  %v4318_v46 = vpop.eup %4317 }
 0x577   : > { %v2476_v48 = vpop.xlane.xlu0 %2475  ;;  %4100 = vmatpush3.bf16.msra.mxu0 %v2736_v15  ;;  %4101 = vmatprep.mubr.msk.bf16.mxu0 %vm4530_vm2, %v4529_v17  ;;  %v2490_v31 = vmul.f32 %v4318_v46, %v5154_v42 }
 0x578   : > { %4321 = vrcp.f32 %v2476_v48  ;;  %v2497_v49 = vpack.c.bf16 %v2489_v26, %v2489_v26  ;;  %4111 = vmatprep.subr.bf16.mxu0 %v4529_v17 }
 0x579   : > { %v2498_v40 = vpack.c.bf16 %v2490_v31, %v2490_v31 }
 0x57a   : > { %4096 = vmatmul.mubr.msk.bf16.vlgmr.msra.gmra.mrb[24].mxu1 %vm2028_vm3, %v2497_v49 }
 0x57b   : > { %4106 = vmatpush3.bf16.msra.mxu1 %v2782_v21  ;;  %4107 = vmatprep.mubr.msk.bf16.mxu1 %vm4530_vm2, %v4529_v17 }
 0x57c   : > { %4117 = vmatprep.subr.bf16.mxu1 %v4529_v17 }
 0x57d   : > { %v4320_v63 = vpop.eup %4319 }
 0x57e   : > { %v2491_v50 = vmul.f32 %v4320_v63, %v5171_v62  ;;  %4102 = vmatmul.mubr.msk.bf16.vlgmr.msra.gmra.mrb[36].mxu0 %vm2028_vm3, %v2498_v40  ;;  %v4277_v62 = vld [vmem:[%s5540_s19] sm:$0xff]  }
 0x57f   : > { %4112 = vmatpush3.bf16.msra.mxu0 %v2828_v22  ;;  %4113 = vmatprep.mubr.msk.bf16.mxu0 %vm4530_vm2, %v4529_v17 }
 0x580   : > { %v2499_v42 = vpack.c.bf16 %v2491_v50, %v2491_v50  ;;  %4125 = vmatprep.subr.bf16.mxu0 %v4529_v17 }
 0x582   : > { %v4322_v51 = vpop.eup %4321  ;;  %4108 = vmatmul.mubr.msk.bf16.vlgmr.msra.gmra.mrb[28].mxu1 %vm2028_vm3, %v2499_v42 }
 0x583   : > { %v2492_v52 = vmul.f32 %v4322_v51, %v5180_v19  ;;  %4121 = vmatprep.mubr.msk.bf16.mxu1 %vm4530_vm2, %v4529_v17  ;;  %4118 = vmatpush3.bf16.msra.mxu1 %v4277_v62 }
 0x584   : > { %4119 = vmatprep.subr.bf16.mxu1 %v4529_v17 }
 0x585   : > { %v2500_v53 = vpack.c.bf16 %v2492_v52, %v2492_v52 }
 0x587   : > { %4114 = vmatmul.mubr.msk.bf16.vlgmr.msra.gmra.mrb[40].mxu0 %vm2028_vm3, %v2500_v53 }
 0x588   : > { %4129 = vmatprep.mubr.msk.bf16.mxu0 %vm4530_vm2, %v4529_v17 }
 0x63d   : > { %v2542_v54 = vpop.f32.mrb[16].mxu1 }
 0x63e   : > { %v2588_v47 = vpop.f32.mrb[28].mxu0  ;;  %v4073_v55 = vpop.f32.mrb[17].mxu1  ;;  %v2870_v60 = vpack.c.bf16 %v2542_v54, %v2542_v54 }
 0x63f   : > { %v4079_v56 = vpop.f32.mrb[29].mxu0  ;;  %v2545_v57 = vpop.f32.mrb[18].mxu1  ;;  %v2871_v4 = vpack.c.bf16 %v2588_v47, %v2588_v47 }
 0x640   : > { %v2591_v58 = vpop.f32.mrb[30].mxu0  ;;  %v4074_v19 = vpop.f32.mrb[19].mxu1  ;;  %v2881_v3 = vshrl.u32 %v2870_v60, 16 }
 0x641   : > { %v4080_v59 = vpop.f32.mrb[31].mxu0  ;;  %v2893_v13 = vshrl.u32 %v2871_v4, 16 }
 0x645   : > { %v2634_v61 = vpop.f32.mrb[20].mxu1 }
 0x646   : > { %v2872_v0 = vpack.c.bf16 %v2634_v61, %v2634_v61  ;;  %v4085_v1 = vpop.f32.mrb[21].mxu1 }
 0x647   : > { %v2637_v2 = vpop.f32.mrb[22].mxu1 }
 0x648   : > { %v2880_v5 = vpack.i.b16 %v2872_v0, %v2870_v60  ;;  %v2882_v6 = vshrl.u32 %v2872_v0, 16  ;;  %v4086_v7 = vpop.f32.mrb[23].mxu1 }
 0x649   : > { %v2680_v10 = vpop.f32.mrb[32].mxu0 }
 0x64a   : > { %v2883_v9 = vpack.i.b16 %v2882_v6, %v2881_v3  ;;  %v2873_v15 = vpack.c.bf16 %v2680_v10, %v2680_v10  ;;  %v4091_v18 = vpop.f32.mrb[33].mxu0  ;;  %v2909_v45 = vrot.slane %v2880_v5, %v5004_v14 }
 0x64b   : > { %v2683_v12 = vpop.f32.mrb[34].mxu0 }
 0x64c   : > { %v2892_v20 = vpack.i.b16 %v2873_v15, %v2871_v4  ;;  %v2894_v21 = vshrl.u32 %v2873_v15, 16  ;;  %v4092_v22 = vpop.f32.mrb[35].mxu0  ;;  %v2943_v40 = vrot.slane %v2883_v9, %v5004_v14 }
 0x64d   : > { %v2726_v23 = vpop.f32.mrb[24].mxu1 }
 0x64e   : > { %v2895_v27 = vpack.i.b16 %v2894_v21, %v2893_v13  ;;  %v4097_v28 = vpop.f32.mrb[25].mxu1  ;;  %v2874_v34 = vpack.c.bf16 %v2726_v23, %v2726_v23  ;;  %v2977_v58 = vrot.slane %v2892_v20, %v5004_v14 }
 0x64f   : > { %v2729_v24 = vpop.f32.mrb[26].mxu1 }
 0x650   : > { %v4098_v29 = vpop.f32.mrb[27].mxu1  ;;  %v2887_v16 = vshrl.u32 %v2874_v34, 16  ;;  %v3011_v2 = vrot.slane %v2895_v27, %v5004_v14 }
 0x651   : > { %v2772_v30 = vpop.f32.mrb[36].mxu0 }
 0x652   : > { %v4103_v32 = vpop.f32.mrb[37].mxu0  ;;  %v2875_v44 = vpack.c.bf16 %v2772_v30, %v2772_v30 }
 0x653   : > { %v2775_v33 = vpop.f32.mrb[38].mxu0 }
 0x654   : > { %v4104_v35 = vpop.f32.mrb[39].mxu0  ;;  %v2899_v52 = vshrl.u32 %v2875_v44, 16 }
 0x655   : > { %v2818_v36 = vpop.f32.mrb[28].mxu1 }
 0x656   : > { %v2876_v37 = vpack.c.bf16 %v2818_v36, %v2818_v36  ;;  %v4109_v38 = vpop.f32.mrb[29].mxu1 }
 0x657   : > { %v2821_v11 = vpop.f32.mrb[30].mxu1 }
 0x658   : > { %v2886_v39 = vpack.i.b16 %v2876_v37, %v2874_v34  ;;  %v2888_v41 = vshrl.u32 %v2876_v37, 16  ;;  %v4110_v43 = vpop.f32.mrb[31].mxu1 }
 0x65a   : > { %v2889_v26 = vpack.i.b16 %v2888_v41, %v2887_v16  ;;  %v2917_v46 = vrot.slane %v2886_v39, %v5004_v14  ;;  %v2864_v48 = vpop.f32.mrb[40].mxu0  ;;  %v4278_v39 = vld [vmem:[%s5540_s19 + $0x8] sm:$0xff]  }
 0x65b   : > { %v2877_v31 = vpack.c.bf16 %v2864_v48, %v2864_v48  ;;  %v4115_v49 = vpop.f32.mrb[41].mxu0  ;;  %4120 = vmatpush3.bf16.msra.mxu1 %v4278_v39 }
 0x65c   : > { %v2918_v63 = vcombine.low %v2909_v45, %v2917_v46  ;;  %v2919_v50 = vcombine.high %v2909_v45, %v2917_v46  ;;  %v2951_v42 = vrot.slane %v2889_v26, %v5004_v14  ;;  %v2867_v51 = vpop.f32.mrb[42].mxu0  ;;  %4133 = vmatprep.subr.bf16.mxu1 %v4529_v17 }
 0x65d   : > { %v2898_v53 = vpack.i.b16 %v2877_v31, %v2875_v44  ;;  %v2900_v62 = vshrl.u32 %v2877_v31, 16  ;;  %v4116_v54 = vpop.f32.mrb[43].mxu0 }
 0x65e   : > { %v2926_v47 = vrot.slane %v2918_v63, %v5009_v25  ;;  %v2933_v55 = vrot.slane %v2919_v50, %v5009_v25  ;;  %v2952_v56 = vcombine.low %v2943_v40, %v2951_v42  ;;  %v2953_v57 = vcombine.high %v2943_v40, %v2951_v42 }
 0x65f   : > { %v2901_v19 = vpack.i.b16 %v2900_v62, %v2899_v52  ;;  %v2985_v59 = vrot.slane %v2898_v53, %v5004_v14 }
 0x660   : > { %v2960_v60 = vrot.slane %v2952_v56, %v5009_v25  ;;  %v2967_v61 = vrot.slane %v2953_v57, %v5009_v25  ;;  %v3038_v0 = vcombine.low %v2926_v47, %v2933_v55  ;;  %v3903_v1 = vcombine.high %v2926_v47, %v2933_v55 }
 0x661   : > { %v2986_v3 = vcombine.low %v2977_v58, %v2985_v59  ;;  %v2987_v4 = vcombine.high %v2977_v58, %v2985_v59  ;;  %v3019_v5 = vrot.slane %v2901_v19, %v5004_v14 }
 0x662   : > { %v3045_v6 = vrot.slane %v3038_v0, %v5004_v14  ;;  %v3053_v7 = vrot.slane %v3903_v1, %v5004_v14  ;;  %v3063_v10 = vcombine.low %v2960_v60, %v2967_v61  ;;  %v3904_v9 = vcombine.high %v2960_v60, %v2967_v61 }
 0x663   : > { %v2994_v15 = vrot.slane %v2986_v3, %v5009_v25  ;;  %v3001_v18 = vrot.slane %v2987_v4, %v5009_v25  ;;  %v3020_v12 = vcombine.low %v3011_v2, %v3019_v5  ;;  %v3021_v13 = vcombine.high %v3011_v2, %v3019_v5  ;;  %v3911_v2 = vld [vmem:[%s5541_s28] ss:$0 sm:$0xff] }
 0x664   : > { %v3070_v20 = vrot.slane %v3063_v10, %v5004_v14  ;;  %v3078_v21 = vrot.slane %v3904_v9, %v5004_v14  ;;  %v3054_v22 = vcombine.low %v3045_v6, %v3053_v7  ;;  %v4331_v7 = vld [vmem:[#allocation2] sm:$0xff] }
 0x665   : > { %v3028_v23 = vrot.slane %v3020_v12, %v5009_v25  ;;  %v3035_v27 = vrot.slane %v3021_v13, %v5009_v25  ;;  %v3088_v28 = vcombine.low %v2994_v15, %v3001_v18  ;;  %v3905_v24 = vcombine.high %v2994_v15, %v3001_v18  ;;  %v4332_v18 = vld [vmem:[#allocation2 + $0x8] sm:$0xff] }
 0x666   : > { %v3061_v29 = vrot.slane %v3054_v22, %v5009_v25  ;;  %v3079_v30 = vcombine.low %v3070_v20, %v3078_v21 }
 0x667   : > { %v3095_v32 = vrot.slane %v3088_v28, %v5004_v14  ;;  %v3103_v33 = vrot.slane %v3905_v24, %v5004_v14  ;;  %v3113_v34 = vcombine.low %v3028_v23, %v3035_v27  ;;  %v3906_v35 = vcombine.high %v3028_v23, %v3035_v27 }
 0x668   : > { %v3086_v36 = vrot.slane %v3079_v30, %v5009_v25  ;;  %v3062_v37 = vcombine.high %v3061_v29, %v4536_v8  ;;  %v3141_v41 = vshrl.u32 %v3061_v29, 16 }
 0x669   : > { %v3120_v38 = vrot.slane %v3113_v34, %v5004_v14  ;;  %v3128_v11 = vrot.slane %v3906_v35, %v5004_v14  ;;  %v3104_v16 = vcombine.low %v3095_v32, %v3103_v33  ;;  %v4279_v34 = vld [vmem:[%s5542_s22] sm:$0xff]   ;;  %v4280_v35 = vld [vmem:[%s5542_s22 + $0x8] sm:$0xff]  }
 0x66a   : > { %v3142_v43 = vshrl.u32 %v3086_v36, 16  ;;  %v3087_v44 = vcombine.high %v3086_v36, %v4536_v8  ;;  %v3140_v45 = vpack.i.b16 %v3086_v36, %v3061_v29  ;;  %v3147_v49 = vshrl.u32 %v3062_v37, 16  ;;  %4126 = vmatpush3.bf16.msra.mxu0 %v4279_v34 }
 0x66b   : > { %v3111_v26 = vrot.slane %v3104_v16, %v5009_v25  ;;  %v3129_v46 = vcombine.low %v3120_v38, %v3128_v11  ;;  %4127 = vmatprep.subr.bf16.mxu0 %v4529_v17 }
 0x66c   : > { %v3143_v48 = vpack.i.b16 %v3142_v43, %v3141_v41  ;;  %v3146_v31 = vpack.i.b16 %v3087_v44, %v3062_v37  ;;  %v3148_v40 = vshrl.u32 %v3087_v44, 16  ;;  %v3915_v43 = vld [vmem:[%s900_s24] ss:$0 sm:$0xff] }
 0x66d   : > { %v3136_v63 = vrot.slane %v3129_v46, %v5009_v25  ;;  %v3112_v14 = vcombine.high %v3111_v26, %v4536_v8  ;;  %v3153_v42 = vshrl.u32 %v3111_v26, 16 }
 0x66e   : > { %v3149_v50 = vpack.i.b16 %v3148_v40, %v3147_v49  ;;  %4128 = vmatpush3.bf16.msra.mxu0 %v4280_v35 }
 0x66f   : > { %v3154_v51 = vshrl.u32 %v3136_v63, 16  ;;  %v3137_v52 = vcombine.high %v3136_v63, %v4536_v8  ;;  %v3152_v53 = vpack.i.b16 %v3136_v63, %v3111_v26  ;;  %v3159_v62 = vshrl.u32 %v3112_v14, 16 }
 0x671   : > { %v3155_v54 = vpack.i.b16 %v3154_v51, %v3153_v42  ;;  %v3158_v47 = vpack.i.b16 %v3137_v52, %v3112_v14  ;;  %v3160_v55 = vshrl.u32 %v3137_v52, 16  ;;  %v3907_v56 = vcombine.low %v3140_v45, %v3152_v53  ;;  %v4281_v14 = vld [vmem:[%s4926_s15] sm:$0xff]   ;;  %v4283_v42 = vld [vmem:[%s4926_s15 + $0x10] sm:$0xff]   ;;  %v4284_v51 = vld [vmem:[%s4926_s15 + $0x18] sm:$0xff]  }
 0x672   : > { %v4285_v52 = vld [vmem:[%s4926_s15 + $0x20] sm:$0xff]   ;;  %v4286_v53 = vld [vmem:[%s4926_s15 + $0x28] sm:$0xff]  }
 0x673   : > { %v3908_v57 = vcombine.low %v3143_v48, %v3155_v54  ;;  %v3909_v58 = vcombine.low %v3146_v31, %v3158_v47  ;;  %v3161_v19 = vpack.i.b16 %v3160_v55, %v3159_v62  ;;  %v3916_v48 = vld [vmem:[%s903_s27] ss:$0 sm:$0xff] }
 0x674   : > { %v3917_v62 = vld [vmem:[%s906_s14] ss:$0 sm:$0xff] }
 0x675   : > { %3168 = vrot.lane.b32.xlu1 %v3908_v57, %s4537_s25  ;;  %3173 = vrot.lane.b32.xlu0 %v3909_v58, %s4538_s26  ;;  %v3910_v25 = vcombine.low %v3149_v50, %v3161_v19  ;;  %v4282_v50 = vld [vmem:[%s4926_s15 + $0x8] sm:$0xff]  }
 0x679   : > { %3178 = vrot.lane.b32.xlu1 %v3910_v25, %s4539_s29 }
 0x6e7   : > { %v3169_v59 = vpop.permute.xlu1 %3168  ;;  %v3174_v60 = vpop.permute.xlu0 %3173 }
 0x6e8   : > { %v3182_v8 = vsel %vm2028_vm3, %v3907_v56, %v3169_v59 }
 0x6e9   : > { %v3185_v61 = vsel %vm3183_vm5, %v3182_v8, %v3174_v60 }
 0x6eb   : > { %v3179_v0 = vpop.permute.xlu1 %3178 }
 0x6ec   : > { %v3188_v1 = vsel %vm3186_vm6, %v3185_v61, %v3179_v0 }
 0x6ed   : > { %4122 = vmatmul.mubr.msk.bf16.vlgmr.msra.gmra.mrb[32].mxu1 %vm930_vm1, %v3188_v1 }
 0x6ee   : > { %4145 = vmatprep.mubr.msk.bf16.mxu1 %vm4530_vm2, %v4529_v17  ;;  %4134 = vmatpush3.bf16.msra.mxu1 %v4281_v14 }
 0x6ef   : > { %4135 = vmatprep.subr.bf16.mxu1 %v4529_v17 }
 0x6f2   : > { %4136 = vmatpush3.bf16.msra.mxu1 %v4282_v50 }
 0x6f3   : > { %4137 = vmatprep.subr.bf16.mxu1 %v4529_v17 }
 0x6f6   : > { %4138 = vmatpush3.bf16.msra.mxu1 %v4283_v42 }
 0x6f7   : > { %4139 = vmatprep.subr.bf16.mxu1 %v4529_v17 }
 0x6fa   : > { %4140 = vmatpush3.bf16.msra.mxu1 %v4284_v51 }
 0x6fb   : > { %4141 = vmatprep.subr.bf16.mxu1 %v4529_v17 }
 0x6fe   : > { %4142 = vmatpush3.bf16.msra.mxu1 %v4285_v52 }
 0x6ff   : > { %4143 = vmatprep.subr.bf16.mxu1 %v4529_v17 }
 0x702   : > { %4144 = vmatpush3.bf16.msra.mxu1 %v4286_v53 }
 0x7c0   : > { %v3248_v3 = vpop.f32.mrb[32].mxu1 }
 0x7c1   : > { %v3249_v4 = vadd.f32 %v3911_v2, %v3248_v3  ;;  %v4123_v5 = vpop.f32.mrb[33].mxu1 }
 0x7c2   : > { %v3251_v6 = vpop.f32.mrb[34].mxu1 }
 0x7c3   : > { %v5294_v10 = vadd.f32 %v4331_v7, %v3249_v4  ;;  %v3252_v9 = vadd.f32 %v3911_v2, %v3251_v6  ;;  %v4124_v15 = vpop.f32.mrb[35].mxu1 }
 0x7c5   : > { %v5296_v12 = vadd.f32 %v4332_v18, %v3252_v9  ;;  %v3259_v13 = vsel %vm930_vm1, %v5294_v10, 0.0 }
 0x7c6   : > { %3260 = vadd.xlane.f32.xlu1 %v3259_v13 }
 0x7c7   : > { %v3262_v20 = vsel %vm930_vm1, %v5296_v12, 0.0 }
 0x7c8   : > { %3263 = vadd.xlane.f32.xlu0 %v3262_v20  ;;  %v3921_v20 = vld [vmem:[%s914_s3] ss:$0 sm:$0xff]  ;;  %s5545_s3 = sld [smem:[#allocation41_spill]] (!%p3929_p1) }
 0x853   : > { %v3261_v21 = vpop.xlane.xlu1 %3260 }
 0x854   : > { %v3265_v22 = vmul.f32 0.03125, %v3261_v21 }
 0x855   : > { %v3264_v23 = vpop.xlane.xlu0 %3263 }
 0x856   : > { %v3267_v27 = vsub.f32 %v5294_v10, %v3265_v22  ;;  %v3266_v28 = vmul.f32 0.03125, %v3264_v23 }
 0x858   : > { %v3268_v24 = vsub.f32 %v5296_v12, %v3266_v28  ;;  %v3269_v29 = vmul.f32 %v3267_v27, %v3267_v27 }
 0x85a   : > { %v3271_v30 = vsel %vm930_vm1, %v3269_v29, 0.0  ;;  %v3270_v32 = vmul.f32 %v3268_v24, %v3268_v24 }
 0x85b   : > { %3272 = vadd.xlane.f32.xlu0 %v3271_v30 }
 0x85c   : > { %v3274_v33 = vsel %vm930_vm1, %v3270_v32, 0.0 }
 0x85d   : > { %3275 = vadd.xlane.f32.xlu1 %v3274_v33 }
 0x8e8   : > { %v3273_v36 = vpop.xlane.xlu0 %3272 }
 0x8e9   : > { %v3277_v37 = vmul.f32 0.03125, %v3273_v36 }
 0x8ea   : > { %v3276_v38 = vpop.xlane.xlu1 %3275 }
 0x8eb   : > { %v3279_v11 = vadd.f32 1e-06, %v3277_v37  ;;  %v3278_v16 = vmul.f32 0.03125, %v3276_v38 }
 0x8ed   : > { %4323 = vrsqrt.f32 %v3279_v11  ;;  %v3280_v39 = vadd.f32 1e-06, %v3278_v16 }
 0x8ef   : > { %4325 = vrsqrt.f32 %v3280_v39 }
 0x8f7   : > { %v4324_v41 = vpop.eup %4323 }
 0x8f8   : > { %v3283_v44 = vmul.f32 %v4324_v41, %v3267_v27 }
 0x8f9   : > { %v4326_v45 = vpop.eup %4325 }
 0x8fa   : > { %v3291_v26 = vmul.f32 %v3915_v43, %v3283_v44  ;;  %v3284_v46 = vmul.f32 %v4326_v45, %v3268_v24 }
 0x8fc   : > { %v3292_v31 = vmul.f32 %v3915_v43, %v3284_v46  ;;  %v3299_v49 = vadd.f32 %v3916_v48, %v3291_v26 }
 0x8fe   : > { %v3300_v40 = vadd.f32 %v3916_v48, %v3292_v31  ;;  %v3930_v31 = vld [vmem:[%s5545_s3] ss:$0 sm:$0xff] (!%p3929_p1) }
 0x900   : > { %v3301_v63 = vpack.c.bf16 %v3300_v40, %v3299_v49  ;;  %v3931_v40 = vld [vmem:[%s5546_s7] ss:$0 sm:$0xff] (!%p3929_p1) }
 0x902   : > { %4130 = vmatmul.mubr.msk.bf16.vlgmr.msra.gmra.mrb[44].mxu0 %vm930_vm1, %v3301_v63 }
 0x9d5   : > { %v3362_v54 = vpop.f32.mrb[44].mxu0 }
 0x9d6   : > { %v3363_v47 = vadd.f32 %v3917_v62, %v3362_v54  ;;  %v4131_v55 = vpop.f32.mrb[45].mxu0 }
 0x9d7   : > { %v3365_v56 = vpop.f32.mrb[46].mxu0 }
 0x9d8   : > { %v3371_v57 = vmul.f32 0.044715, %v3363_v47  ;;  %v3366_v58 = vadd.f32 %v3917_v62, %v3365_v56  ;;  %v4132_v19 = vpop.f32.mrb[47].mxu0  ;;  %v3369_v6 = vmul.f32 0.5, %v3363_v47 }
 0x9da   : > { %v3373_v25 = vmul.f32 %v3371_v57, %v3363_v47  ;;  %v3372_v59 = vmul.f32 0.044715, %v3366_v58  ;;  %v3370_v7 = vmul.f32 0.5, %v3366_v58 }
 0x9dc   : > { %v3375_v8 = vmul.f32 %v3373_v25, %v3363_v47  ;;  %v3374_v60 = vmul.f32 %v3372_v59, %v3366_v58 }
 0x9de   : > { %v3377_v61 = vadd.f32 %v3375_v8, %v3363_v47  ;;  %v3376_v0 = vmul.f32 %v3374_v60, %v3366_v58 }
 0x9e0   : > { %v3379_v17 = vmul.f32 0.7978846, %v3377_v61  ;;  %v3378_v1 = vadd.f32 %v3376_v0, %v3366_v58 }
 0x9e2   : > { %4327 = vtanh.f32 %v3379_v17  ;;  %v3380_v2 = vmul.f32 0.7978846, %v3378_v1 }
 0x9e4   : > { %4329 = vtanh.f32 %v3380_v2 }
 0x9ec   : > { %v4328_v3 = vpop.eup %4327 }
 0x9ed   : > { %v3383_v4 = vadd.f32 1.0, %v4328_v3 }
 0x9ee   : > { %v4330_v5 = vpop.eup %4329 }
 0x9ef   : > { %v3384_v9 = vadd.f32 1.0, %v4330_v5  ;;  %v3385_v15 = vmul.f32 %v3383_v4, %v3369_v6 }
 0x9f1   : > { %v3386_v18 = vmul.f32 %v3384_v9, %v3370_v7 }
 0x9f3   : > { %v3387_v13 = vpack.c.bf16 %v3386_v18, %v3385_v15 }
 0x9f5   : > { %4146 = vmatmul.mubr.msk.bf16.vlgmr.msra.gmra.mrb[36].mxu1 %vm3443_vm7, %v3387_v13 }
 0xac8   : > { %v3481_v21 = vpop.f32.mrb[36].mxu1 }
 0xac9   : > { %v3482_v22 = vadd.f32 %v3921_v20, %v3481_v21  ;;  %v4147_v23 = vpop.f32.mrb[37].mxu1  ;;  %3495 = sbr.rel (%p3929_p1) target bundleno = 3083 (0xc0b), region = 112 }
 0xaca   : > { %v3484_v27 = vpop.f32.mrb[38].mxu1 }
 0xacb   : > { %v3488_v28 = vadd.f32 %v3482_v22, %v5294_v10  ;;  %v3485_v24 = vadd.f32 %v3921_v20, %v3484_v27  ;;  %v4148_v29 = vpop.f32.mrb[39].mxu1 }
 0xacd   : > { %3490 = vst.msk [vmem:[#allocation2] sm:$0xff] %vm930_vm1, %v3488_v28  ;;  %v3489_v30 = vadd.f32 %v3485_v24, %v5296_v12  ;;  %v3498_v32 = vsel (!%p3929_p1), %vm930_vm1, %v3488_v28, 0.0 }
 0xace   : > { %3499 = vadd.xlane.f32.xlu0 (!%p3929_p1), %v3498_v32 }
 0xacf   : > { %3491 = vst.msk [vmem:[#allocation2 + $0x8] sm:$0xff] %vm930_vm1, %v3489_v30  ;;  %v3501_v33 = vsel (!%p3929_p1), %vm930_vm1, %v3489_v30, 0.0 }
 0xad2   : > { %3502 = vadd.xlane.f32.xlu0 %v3501_v33 }
 0xb5b   : > { %v3500_v34 = vpop.xlane.xlu0 %3499 }
 0xb5c   : > { %v3504_v35 = vmul.f32 0.03125, %v3500_v34 }
 0xb5e   : > { %v3506_v10 = vsub.f32 %v3488_v28, %v3504_v35 }
 0xb5f   : > { %v3503_v36 = vpop.xlane.xlu0 %3502 }
 0xb60   : > { %v3505_v37 = vmul.f32 0.03125, %v3503_v36  ;;  %v3508_v38 = vmul.f32 %v3506_v10, %v3506_v10 }
 0xb62   : > { %v3507_v11 = vsub.f32 %v3489_v30, %v3505_v37  ;;  %v3510_v12 = vsel %vm930_vm1, %v3508_v38, 0.0 }
 0xb63   : > { %3511 = vadd.xlane.f32.xlu1 %v3510_v12 }
 0xb64   : > { %v3509_v16 = vmul.f32 %v3507_v11, %v3507_v11 }
 0xb66   : > { %v3513_v39 = vsel %vm930_vm1, %v3509_v16, 0.0 }
 0xb67   : > { %3514 = vadd.xlane.f32.xlu1 %v3513_v39 }
 0xbf0   : > { %v3512_v41 = vpop.xlane.xlu1 %3511 }
 0xbf1   : > { %v3516_v43 = vmul.f32 0.03125, %v3512_v41 }
 0xbf3   : > { %v3518_v44 = vadd.f32 1e-06, %v3516_v43 }
 0xbf4   : > { %v3515_v45 = vpop.xlane.xlu1 %3514 }
 0xbf5   : > { %4333 = vrsqrt.f32 %v3518_v44  ;;  %v3517_v26 = vmul.f32 0.03125, %v3515_v45 }
 0xbf7   : > { %v3519_v46 = vadd.f32 1e-06, %v3517_v26 }
 0xbf9   : > { %4335 = vrsqrt.f32 %v3519_v46 }
 0xbff   : > { %v4334_v48 = vpop.eup %4333 }
 0xc00   : > { %v3522_v49 = vmul.f32 %v4334_v48, %v3506_v10 }
 0xc02   : > { %v3530_v63 = vmul.f32 %v3930_v31, %v3522_v49 }
 0xc03   : > { %v4336_v14 = vpop.eup %4335 }
 0xc04   : > { %v3538_v50 = vadd.f32 %v3931_v40, %v3530_v63  ;;  %v3523_v42 = vmul.f32 %v4336_v14, %v3507_v11 }
 0xc06   : > { %3540 = vst.msk [vmem:[%s4928_s16] sm:$0xff] %vm930_vm1, %v3538_v50  ;;  %v3531_v51 = vmul.f32 %v3930_v31, %v3523_v42 }
 0xc08   : > { %v3539_v52 = vadd.f32 %v3931_v40, %v3531_v51 }
 0xc0a   : > { %3541 = vst.msk [vmem:[%s4928_s16 + $0x8] sm:$0xff] %vm930_vm1, %v3539_v52 }
 0xc0b PF: > { %s5547_s8 = sld [smem:[#allocation17_spill]]  ;;  %s5548_s19 = sld [smem:[#allocation13_spill]] }
 0xc0c   : > { %s5549_s26 = sld [smem:[#allocation25_spill]]  ;;  %s5550_s28 = sld [smem:[#allocation43_spill]] }
 0xc0d   : > { %s3556_s18 = sshll.u32 %s4928_s16, 4  ;;  %s4540_s24 = smov [#allocation8]   ;;  %s5367_s18 = int_to_ptr.vmem [resolvable:$true] %s3556_s18 }
 0xc0e   : > { %s4397_s30 = scalar_lea.vmem %s5367_s18, 256  ;;  %s4401_s27 = sshll.u32 %s4540_s24, 4  ;;  %s4402_s27 = int_to_ptr.vmem [resolvable:$false] %s4401_s27 }
 0xc0f   : > { %p4398_p10 = scmp.ne.s32.totalorder %s5367_s18, %s4397_s30  ;;  %s4403_s23 = scalar_lea.vmem %s4402_s27, 512 }
 0xc10   : > { %p4404_p13 = scmp.lt.s32.totalorder %s5367_s18, %s4402_s27  ;;  %p4405_p0 = scmp.lt.s32.totalorder %s4403_s23, %s4397_s30 }
 0xc11   : > { %s3942_s29 = sshll.u32 %s5547_s8, 8  ;;  %s5551_s13 = sand.u32 1, %s5548_s19  }
 0xc12   : > { %s5364_s22 = scalar_lea.hbm %s5550_s28, %s3942_s29  ;;  %s5371_s1 = scalar_lea.sflag [#allocation5], %s5551_s13 }
 0xc13   : > { %p5552_p11 = scmp.ne.s32.totalorder %s5549_s26, 0  ;;  %p4406_p5 = por %p4405_p0, %p4404_p13 }
 0xc15   : > { %p4399_p12 = pnand %p4398_p10, %p5552_p11 }
 0xc17   : > { %p4400_p2 = pneg %p4399_p12 }
 0xc19   : > { %p4407_p7 = pnand %p4406_p5, %p4400_p2 }
 0xc1b   : > { %4410 = shalt.err (!%p4407_p7)
}
 0xc1c   : > { %s4411_s16 = scalar_lea.hbm %s5364_s22, 256  ;;  %s4415_s0 = scalar_lea.hbm %s5550_s28, 512 }
 0xc1d   : > { %p4412_p3 = scmp.ne.s32.totalorder %s5364_s22, %s4411_s16  ;;  %p4416_p6 = scmp.lt.u32.totalorder %s5364_s22, %s5550_s28 }
 0xc1e   : > { %p4417_p9 = scmp.lt.u32.totalorder %s4415_s0, %s4411_s16  ;;  %p4419_p10 = scmp.lt.u32.totalorder %s4411_s16, %s5364_s22 }
 0xc1f   : > { %p4413_p8 = pnand %p4412_p3, %p5552_p11 }
 0xc20   : > { %p4418_p1 = por %p4417_p9, %p4416_p6 }
 0xc21   : > { %p4414_p4 = pneg %p4413_p8 }
 0xc22   : > { %p4420_p12 = por %p4419_p10, %p4418_p1 }
 0xc24   : > { %p4421_p2 = pnand %p4420_p12, %p4414_p4 }
 0xc26   : > { %4424 = shalt.err (!%p4421_p2)
}
 0xc27   : > { %s4541_s3 = smov 128  }
 0xc28   : > { %4154 = dma.vmem_to_hbm [thread:$0]  (%p5552_p11), %s5367_s18, 256, %s5364_s22, %s5371_s1, %s4541_s3, %s4541_s3, %s4537_s25  }
 0xc29 PF: > { %s5553_s21 = sld [smem:[#allocation20_spill]]  ;;  %s5554_s5 = sld [smem:[#allocation12_spill]] }
 0xc2a   : > { %s5555_s7 = sld [smem:[#allocation26_spill]] }
 0xc2f   : > { %p4168_p13 = scmp.ge.s32.totalorder %s5553_s21, 2  ;;  %s3571_s8 = sand.u32 1, %s5554_s5  }
 0xc30   : > { %p5556_p0 = scmp.ne.s32.totalorder %s5555_s7, 0  ;;  %s3572_s19 = scalar_lea.sflag [#allocation5], %s3571_s8 }
 0xc32   : > { %p4164_p5 = pnand %p4168_p13, %p5556_p0 }
 0xc34   : > { %4478 = dma.done.wait (!%p4164_p5), %s3572_s19, 256  }
 0xc35   : > { %4480 = vsyncadd (!%p4164_p5), %s3572_s19, 4294967040  ;;  %s38_s3 = sadd.s32 1, %s5553_s21   ;;  %s5557_s0 = sld [smem:[#allocation13_spill]] }
 0xc36   : > { %p35_p7 = scmp.ge.s32.totalorder %s38_s3, 6   ;;  %s5558_s30 = sld [smem:[#allocation14_spill]] }
 0xc37   : > { %s5559_s20 = sld [smem:[#allocation24_spill]]  ;;  %s5560_s21 = sld [smem:[#allocation15_spill]] }
 0xc38   : > { %s5561_s1 = sld [smem:[#allocation16_spill]]  ;;  %s5562_s22 = sld [smem:[#allocation23_spill]] }
 0xc39   : > { %s5563_s2 = sld [smem:[#allocation18_spill]]  ;;  %s5564_s23 = sld [smem:[#allocation19_spill]] }
 0xc3a   : > { %s5565_s24 = sld [smem:[#allocation21_spill]]  ;;  %s5566_s25 = sld [smem:[#allocation22_spill]] }
 0xc3b   :  { %37 = sbr.rel (!%p35_p7) target bundleno = 27 (0x1b), region = 207 }
 0xc42   :  { %3577 = vsyncpa [#allocation4], 1 }
 0xc43   :  { %3579 = vsyncpa [#allocation4 + $0x1], 1 }
 0xc44   :  { %3580 = vsyncpa [#allocation7], 1 }
 0xc45   :  { %3582 = vsyncpa [#allocation7 + $0x1], 1 }
 0xc46   :  { %3583 = vsyncpa [#allocation5], 1 }
 0xc47   :  { %3585 = vsyncpa [#allocation5 + $0x1], 1 }

</bundles_post_ra>
